<compile_context>
chip_gen: v7x
topology: tpu7x:2x2x1
jax: 0.10.0
libtpu: 0.0.40
codegen_flags: <defaults>
</compile_context>

<pallas_src>
import functools

import jax
import jax.numpy as jnp
from jax import lax
from jax.experimental import pallas as pl
from jax.experimental.pallas import tpu as pltpu

NUM_GROUPS = 32
EPS = 1e-6
_MIB = 1024 * 1024


# ---------------------------------------------------------------------------
# Kernel 1: GroupNorm statistics (single merged pass: sum(x), sum(x*x))
# ---------------------------------------------------------------------------
def _gn_stats_kernel(x_ref, s_ref):
    @pl.when(pl.program_id(1) == 0)
    def _():
        s_ref[...] = jnp.zeros_like(s_ref)

    x = x_ref[0]                                    # (tm, C) f32
    s1 = jnp.sum(x, axis=0, keepdims=True)          # (1, C)
    s2 = jnp.sum(x * x, axis=0, keepdims=True)      # (1, C)
    s_ref[0] += jnp.concatenate([s1, s2], axis=0)   # (2, C) accumulator


# ---------------------------------------------------------------------------
# Kernel 2: GroupNorm apply + q|k|v projection (tiled over HW)
# ---------------------------------------------------------------------------
def _gn_qkv_kernel(x_ref, ss_ref, wq_ref, wk_ref, wv_ref, bq_ref, bk_ref, bv_ref,
                   q_ref, k_ref, v_ref):
    x = x_ref[0]                                    # (tm, C) f32
    ss = ss_ref[0]                                  # (2, C): scale | shift
    scale = ss[0:1, :]
    shift = ss[1:2, :]
    h = (x * scale + shift).astype(jnp.bfloat16)    # (tm, C) bf16 MXU operand

    # Three separate dots stored straight to their outputs: no (tm,3C) f32
    # temporary, no lane slicing of a fused 3C result.
    q_ref[0] = (jnp.dot(h, wq_ref[...], preferred_element_type=jnp.float32)
                + bq_ref[...]).astype(jnp.bfloat16)
    k_ref[0] = (jnp.dot(h, wk_ref[...], preferred_element_type=jnp.float32)
                + bk_ref[...]).astype(jnp.bfloat16)
    v_ref[0] = (jnp.dot(h, wv_ref[...], preferred_element_type=jnp.float32)
                + bv_ref[...]).astype(jnp.bfloat16)


# ---------------------------------------------------------------------------
# Kernel 3: flash-style attention strip + output projection + residual
# ---------------------------------------------------------------------------
def _attn_proj_kernel(x_ref, q_ref, k_ref, v_ref, wp_ref, bp_ref, o_ref, *, nsub):
    k = k_ref[0]                                    # (HW, C) bf16
    v = v_ref[0]                                    # (HW, C) bf16
    wp = wp_ref[...]                                # (C, C) bf16
    bp = bp_ref[...]                                # (1, C) f32
    q = q_ref[0]                                    # (tq, C) bf16 (pre-scaled by C^-0.5)
    x = x_ref[0]                                    # (tq, C) f32 (residual)

    tq = q.shape[0]
    rows = tq // nsub
    # nsub independent sub-tile chains -> the LLO scheduler can overlap the
    # EUP exp of one sub-tile with the logits / p@v MXU work of the other.
    for s in range(nsub):
        lo = s * rows
        qs = q[lo:lo + rows, :]
        xs = x[lo:lo + rows, :]

        # Logit strip: contract the shared channel dim directly (no k transpose).
        logits = lax.dot_general(qs, k, (((1,), (1,)), ((), ())),
                                 preferred_element_type=jnp.float32)   # (rows, HW)
        m = jnp.max(logits, axis=-1, keepdims=True)
        p = jnp.exp(logits - m)                                        # f32
        denom = jnp.sum(p, axis=-1, keepdims=True)                     # (rows, 1)

        # Deferred softmax normalization: divide AFTER p @ v (EUP reciprocal).
        h_attn = jnp.dot(p.astype(jnp.bfloat16), v,
                         preferred_element_type=jnp.float32)           # (rows, C)
        h_attn = h_attn * pl.reciprocal(denom, approx=True)

        out = jnp.dot(h_attn.astype(jnp.bfloat16), wp,
                      preferred_element_type=jnp.float32) + bp
        o_ref[0, lo:lo + rows, :] = (xs + out).astype(o_ref.dtype)


# ---------------------------------------------------------------------------
# VMEM budget / tile selection (generation-aware)
# ---------------------------------------------------------------------------
def _vmem_budget():
    cap = 64 * _MIB                                  # safe fallback (fits v7x)
    try:
        info = pltpu.get_tpu_info()
        cap = int(getattr(info, "vmem_capacity_bytes", cap)) or cap
    except Exception:
        pass
    return int(0.85 * cap)


def _pick_tile(hw, candidates, fits):
    divisors = [t for t in candidates if hw % t == 0]
    for t in divisors:
        if fits(t):
            return t
    return divisors[-1] if divisors else hw


def _proj_bytes(tm, c):
    return (2 * tm * c * 4            # x tile (double-buffered)
            + 3 * 2 * tm * c * 2      # q/k/v output tiles (double-buffered)
            + 3 * c * c * 2           # Wq|Wk|Wv (single-buffered)
            + tm * c * 6              # in-kernel f32 dot result + bf16 h
            + 2 * _MIB)


def _attn_bytes(tq, hw, c):
    return (2 * hw * c * 2                          # k + v (single-buffered, bf16)
            + 2 * (2 * tq * c * 4 + tq * c * 2)     # x/out f32 + q bf16 tiles (dbl-buf)
            + c * c * 2                             # Wp
            + 3 * tq * hw * 4                       # logits + exp strip (f32) + slack
            + 2 * tq * c * 4                        # h_attn temps
            + 2 * _MIB)


# ---------------------------------------------------------------------------
# Wrapper
# ---------------------------------------------------------------------------
def attn_block_pallas(x_nchw, params):
    """x_nchw: (B, C, H, W) float32. Returns (B, C, H, W) float32."""
    b, c, h, w = x_nchw.shape
    assert c % NUM_GROUPS == 0, "GroupNorm(32) requires C % 32 == 0"
    hw = h * w

    budget = _vmem_budget()
    tm = _pick_tile(hw, (1024, 512, 256, 128, 64, 32, 16, 8),
                    lambda t: _proj_bytes(t, c) <= budget)
    tq = _pick_tile(hw, (512, 256, 128, 64, 32, 16, 8),
                    lambda t: _attn_bytes(t, hw, c) <= budget)
    nsub = 2 if (tq >= 256 and tq % 2 == 0) else 1
    return _attn_block_impl(x_nchw, params, tm=tm, tq=tq, nsub=nsub, vmem=budget)


@functools.partial(jax.jit, static_argnames=("tm", "tq", "nsub", "vmem"))
def _attn_block_impl(x_nchw, params, *, tm, tq, nsub, vmem):
    b, c, h, w = x_nchw.shape
    hw = h * w
    cpg = c // NUM_GROUPS

    # NCHW -> (B, HW, C).
    # TODO(synk): if the surrounding model can stay NHWC, these two transposes
    # (a full HBM round trip of the activations each way) should be fused into
    # the producing/consuming ops instead.
    x = jnp.transpose(x_nchw, (0, 2, 3, 1)).reshape(b, hw, c).astype(jnp.float32)

    def const2(shape):
        # Grid-invariant operand: single-buffered to save VMEM.
        return pl.BlockSpec(shape, lambda i, j: (0,) * len(shape),
                            pipeline_mode=pl.Buffered(1))

    # ---- Kernel 1: GroupNorm statistics ----
    stats = pl.pallas_call(
        _gn_stats_kernel,
        out_shape=jax.ShapeDtypeStruct((b, 2, c), jnp.float32),
        grid_spec=pltpu.PrefetchScalarGridSpec(
            num_scalar_prefetch=0,
            grid=(b, hw // tm),
            in_specs=[pl.BlockSpec((1, tm, c), lambda i, j: (i, j, 0))],
            out_specs=pl.BlockSpec((1, 2, c), lambda i, j: (i, 0, 0)),
        ),
        compiler_params=pltpu.CompilerParams(
            dimension_semantics=("parallel", "arbitrary"),
            vmem_limit_bytes=vmem),
    )(x)

    # Group combine + affine fold on the tiny (B, 2, C) stats array (plain JAX).
    s1, s2 = stats[:, 0, :], stats[:, 1, :]                      # (b, C)
    n = jnp.float32(hw * cpg)
    s1g = jnp.sum(s1.reshape(b, NUM_GROUPS, cpg), axis=2)        # (b, 32)
    s2g = jnp.sum(s2.reshape(b, NUM_GROUPS, cpg), axis=2)
    mean_g = s1g / n
    var_g = s2g / n - mean_g * mean_g
    rstd_g = lax.rsqrt(var_g + EPS)
    mean = jnp.repeat(mean_g, cpg, axis=1)                       # (b, C)
    rstd = jnp.repeat(rstd_g, cpg, axis=1)
    gamma = params["gamma"].reshape(1, c).astype(jnp.float32)
    beta = params["beta"].reshape(1, c).astype(jnp.float32)
    gn_scale = rstd * gamma
    gn_shift = beta - mean * gn_scale
    ss = jnp.stack([gn_scale, gn_shift], axis=1)                 # (b, 2, C)

    # Conv2d 1x1 weight (C_out, C_in, 1, 1) -> matmul weight (C_in, C_out).
    def wt(name):
        return params[name].reshape(c, c).T

    attn_scale = float(c) ** (-0.5)          # folded into Wq / bq
    wq = (wt("wq") * attn_scale).astype(jnp.bfloat16)
    wk = wt("wk").astype(jnp.bfloat16)
    wv = wt("wv").astype(jnp.bfloat16)
    wp = wt("wp").astype(jnp.bfloat16)
    bq = (params["bq"].reshape(1, c) * attn_scale).astype(jnp.float32)
    bk = params["bk"].reshape(1, c).astype(jnp.float32)
    bv = params["bv"].reshape(1, c).astype(jnp.float32)
    bp = params["bp"].reshape(1, c).astype(jnp.float32)

    # ---- Kernel 2: GN apply + QKV projection (tiled over HW) ----
    q_a, k_a, v_a = pl.pallas_call(
        _gn_qkv_kernel,
        out_shape=(jax.ShapeDtypeStruct((b, hw, c), jnp.bfloat16),) * 3,
        grid_spec=pltpu.PrefetchScalarGridSpec(
            num_scalar_prefetch=0,
            grid=(b, hw // tm),
            in_specs=[
                pl.BlockSpec((1, tm, c), lambda i, j: (i, j, 0)),   # x tile
                pl.BlockSpec((1, 2, c), lambda i, j: (i, 0, 0)),    # scale|shift
                const2((c, c)), const2((c, c)), const2((c, c)),     # Wq, Wk, Wv
                const2((1, c)), const2((1, c)), const2((1, c)),     # bq, bk, bv
            ],
            out_specs=(pl.BlockSpec((1, tm, c), lambda i, j: (i, j, 0)),) * 3,
        ),
        compiler_params=pltpu.CompilerParams(
            dimension_semantics=("parallel", "parallel"),
            vmem_limit_bytes=vmem),
    )(x, ss, wq, wk, wv, bq, bk, bv)

    # ---- Kernel 3: attention strips + projection + residual ----
    kv_spec = pl.BlockSpec((1, hw, c), lambda i, j: (i, 0, 0),
                           pipeline_mode=pl.Buffered(1))   # constant over j
    out = pl.pallas_call(
        functools.partial(_attn_proj_kernel, nsub=nsub),
        out_shape=jax.ShapeDtypeStruct((b, hw, c), jnp.float32),
        grid_spec=pltpu.PrefetchScalarGridSpec(
            num_scalar_prefetch=0,
            grid=(b, hw // tq),
            in_specs=[
                pl.BlockSpec((1, tq, c), lambda i, j: (i, j, 0)),   # x (residual)
                pl.BlockSpec((1, tq, c), lambda i, j: (i, j, 0)),   # q tile
                kv_spec,                                            # k (full seq)
                kv_spec,                                            # v (full seq)
                const2((c, c)),                                     # Wp
                const2((1, c)),                                     # bp
            ],
            out_specs=pl.BlockSpec((1, tq, c), lambda i, j: (i, j, 0)),
        ),
        compiler_params=pltpu.CompilerParams(
            dimension_semantics=("parallel", "parallel"),
            vmem_limit_bytes=vmem),
    )(x, q_a, k_a, v_a, wp, bp)

    # (B, HW, C) -> NCHW
    return jnp.transpose(out.reshape(b, h, w, c), (0, 3, 1, 2))


# ---------------- pure-JAX reference (mirrors the PyTorch forward) ----------------
def attn_block_ref(x_nchw, params):
    b, c, h, w = x_nchw.shape
    cpg = c // NUM_GROUPS
    xg = x_nchw.reshape(b, NUM_GROUPS, cpg, h, w)
    mean = jnp.mean(xg, axis=(2, 3, 4), keepdims=True)
    var = jnp.mean((xg - mean) ** 2, axis=(2, 3, 4), keepdims=True)
    hn = ((xg - mean) / jnp.sqrt(var + EPS)).reshape(b, c, h, w)
    hn = hn * params["gamma"].reshape(1, c, 1, 1) + params["beta"].reshape(1, c, 1, 1)

    def conv1x1(t, wname, bname):
        wm = params[wname].reshape(c, c)
        return jnp.einsum("oc,bchw->bohw", wm, t) + params[bname].reshape(1, c, 1, 1)

    q = conv1x1(hn, "wq", "bq").reshape(b, c, h * w).transpose(0, 2, 1)   # (b, hw, c)
    k = conv1x1(hn, "wk", "bk").reshape(b, c, h * w)                      # (b, c, hw)
    v = conv1x1(hn, "wv", "bv").reshape(b, c, h * w)                      # (b, c, hw)
    w_ = jnp.einsum("bic,bcj->bij", q, k) * (float(c) ** (-0.5))
    w_ = jax.nn.softmax(w_, axis=2)
    h_ = jnp.einsum("bcj,bij->bci", v, w_).reshape(b, c, h, w)
    h_ = conv1x1(h_, "wp", "bp")
    return x_nchw + h_


if __name__ == "__main__":
    B, C, H, W = 2, 128, 8, 8          # C must be a multiple of 32 (GroupNorm)
    key = jax.random.PRNGKey(0)
    keys = jax.random.split(key, 12)

    x = jax.random.normal(keys[0], (B, C, H, W), dtype=jnp.float32)

    def init_w(k):
        return 0.05 * jax.random.normal(k, (C, C, 1, 1), dtype=jnp.float32)

    params = {
        "gamma": 1.0 + 0.05 * jax.random.normal(keys[1], (C,), dtype=jnp.float32),
        "beta": 0.05 * jax.random.normal(keys[2], (C,), dtype=jnp.float32),
        "wq": init_w(keys[3]), "bq": 0.01 * jax.random.normal(keys[4], (C,), jnp.float32),
        "wk": init_w(keys[5]), "bk": 0.01 * jax.random.normal(keys[6], (C,), jnp.float32),
        "wv": init_w(keys[7]), "bv": 0.01 * jax.random.normal(keys[8], (C,), jnp.float32),
        "wp": init_w(keys[9]), "bp": 0.01 * jax.random.normal(keys[10], (C,), jnp.float32),
    }

    out = attn_block_pallas(x, params)
    out = jax.block_until_ready(out)

    ref = attn_block_ref(x, params)
    assert out.shape == (B, C, H, W)
    # bf16 MXU operands (weights, q/k/v, softmax probs) + approx reciprocal
    # -> looser tolerance than a pure-fp32 implementation.
    assert jnp.allclose(out, ref, atol=5e-2, rtol=5e-2), float(jnp.max(jnp.abs(out - ref)))

    print("KERNEL_OK")
</pallas_src>

<mosaic_0001>
module attributes {stable_mosaic.version = 11 : i64} {
  func.func @_gn_stats_kernel(%arg0: i32, %arg1: i32, %arg2: memref<1x64x128xf32, #tpu.memory_space<vmem>>, %arg3: memref<1x2x128xf32, #tpu.memory_space<vmem>>) attributes {dimension_semantics = [#tpu.dimension_semantics<parallel>, #tpu.dimension_semantics<arbitrary>], iteration_bounds = array<i64: 2, 1>, scalar_prefetch = 0 : i64, scratch_operands = 0 : i64, tpu.core_type = #tpu.core_type<tc>, window_params = [{transform_indices = @transform_0, window_bounds = array<i64: 1, 64, 128>}, {transform_indices = @transform_1, window_bounds = array<i64: 1, 2, 128>}]} {
    %c0_i32 = arith.constant 0 : i32
    %0 = arith.cmpi eq, %arg1, %c0_i32 : i32
    %1 = arith.extui %0 : i1 to i32
    %c0_i32_0 = arith.constant 0 : i32
    %2 = arith.cmpi ne, %1, %c0_i32_0 : i32
    scf.if %2 {
      %cst_10 = arith.constant 0.000000e+00 : f32
      %17 = vector.broadcast %cst_10 : f32 to vector<1x2x128xf32>
      %c0_11 = arith.constant 0 : index
      %c0_12 = arith.constant 0 : index
      %c0_13 = arith.constant 0 : index
      %18 = vector.load %arg3[%c0_11, %c0_12, %c0_13] : memref<1x2x128xf32, #tpu.memory_space<vmem>>, vector<1x2x128xf32>
      tpu.vector_store %arg3[%c0_11, %c0_12, %c0_13], %17 {strides = array<i32>} : memref<1x2x128xf32, #tpu.memory_space<vmem>>, vector<1x2x128xf32>,
    } else {
    }
    %c0 = arith.constant 0 : index
    %c0_1 = arith.constant 0 : index
    %c0_2 = arith.constant 0 : index
    %3 = vector.load %arg2[%c0, %c0_1, %c0_2] : memref<1x64x128xf32, #tpu.memory_space<vmem>>, vector<1x64x128xf32>
    %4 = vector.shape_cast %3 : vector<1x64x128xf32> to vector<64x128xf32>
    %cst = arith.constant dense<0.000000e+00> : vector<128xf32>
    %5 = vector.multi_reduction <add>, %4, %cst [0] : vector<64x128xf32> to vector<128xf32>
    %6 = vector.shape_cast %5 : vector<128xf32> to vector<1x128xf32>
    %7 = arith.mulf %4, %4 : vector<64x128xf32>
    %cst_3 = arith.constant dense<0.000000e+00> : vector<128xf32>
    %8 = vector.multi_reduction <add>, %7, %cst_3 [0] : vector<64x128xf32> to vector<128xf32>
    %9 = vector.shape_cast %8 : vector<128xf32> to vector<1x128xf32>
    %c0_4 = arith.constant 0 : index
    %c0_5 = arith.constant 0 : index
    %c0_6 = arith.constant 0 : index
    %10 = vector.load %arg3[%c0_4, %c0_5, %c0_6] : memref<1x2x128xf32, #tpu.memory_space<vmem>>, vector<1x2x128xf32>
    %11 = vector.shape_cast %10 : vector<1x2x128xf32> to vector<2x128xf32>
    %12 = tpu.concatenate %6, %9 in 0 : vector<1x128xf32>, vector<1x128xf32> -> vector<2x128xf32>
    %13 = arith.addf %11, %12 : vector<2x128xf32>
    %c0_7 = arith.constant 0 : index
    %c0_8 = arith.constant 0 : index
    %c0_9 = arith.constant 0 : index
    %14 = vector.load %arg3[%c0_7, %c0_8, %c0_9] : memref<1x2x128xf32, #tpu.memory_space<vmem>>, vector<1x2x128xf32>
    %15 = vector.shape_cast %14 : vector<1x2x128xf32> to vector<2x128xf32>
    %16 = vector.shape_cast %13 : vector<2x128xf32> to vector<1x2x128xf32>
    tpu.vector_store %arg3[%c0_7, %c0_8, %c0_9], %16 {strides = array<i32>} : memref<1x2x128xf32, #tpu.memory_space<vmem>>, vector<1x2x128xf32>,
    return
  }
  func.func @transform_0(%arg0: i32, %arg1: i32) -> (i32, i32, i32) {
    %c0_i32 = arith.constant 0 : i32
    %c0_i32_0 = arith.constant 0 : i32
    return %arg0, %arg1, %c0_i32 : i32, i32, i32
  }
  func.func @transform_1(%arg0: i32, %arg1: i32) -> (i32, i32, i32) {
    %c0_i32 = arith.constant 0 : i32
    %c0_i32_0 = arith.constant 0 : i32
    %c0_i32_1 = arith.constant 0 : i32
    return %arg0, %c0_i32, %c0_i32_0 : i32, i32, i32
  }
}

module attributes {stable_mosaic.version = 11 : i64} {
  func.func @_gn_qkv_kernel(%arg0: i32, %arg1: i32, %arg2: memref<1x64x128xf32, #tpu.memory_space<vmem>>, %arg3: memref<1x2x128xf32, #tpu.memory_space<vmem>>, %arg4: memref<128x128xbf16, #tpu.memory_space<vmem>>, %arg5: memref<128x128xbf16, #tpu.memory_space<vmem>>, %arg6: memref<128x128xbf16, #tpu.memory_space<vmem>>, %arg7: memref<1x128xf32, #tpu.memory_space<vmem>>, %arg8: memref<1x128xf32, #tpu.memory_space<vmem>>, %arg9: memref<1x128xf32, #tpu.memory_space<vmem>>, %arg10: memref<1x64x128xbf16, #tpu.memory_space<vmem>>, %arg11: memref<1x64x128xbf16, #tpu.memory_space<vmem>>, %arg12: memref<1x64x128xbf16, #tpu.memory_space<vmem>>) attributes {dimension_semantics = [#tpu.dimension_semantics<parallel>, #tpu.dimension_semantics<parallel>], iteration_bounds = array<i64: 2, 1>, scalar_prefetch = 0 : i64, scratch_operands = 0 : i64, tpu.core_type = #tpu.core_type<tc>, window_params = [{transform_indices = @transform_0, window_bounds = array<i64: 1, 64, 128>}, {transform_indices = @transform_1, window_bounds = array<i64: 1, 2, 128>}, {pipeline_mode = #tpu.pipeline_mode<synchronous>, transform_indices = @transform_2, window_bounds = array<i64: 128, 128>}, {pipeline_mode = #tpu.pipeline_mode<synchronous>, transform_indices = @transform_3, window_bounds = array<i64: 128, 128>}, {pipeline_mode = #tpu.pipeline_mode<synchronous>, transform_indices = @transform_4, window_bounds = array<i64: 128, 128>}, {pipeline_mode = #tpu.pipeline_mode<synchronous>, transform_indices = @transform_5, window_bounds = array<i64: 1, 128>}, {pipeline_mode = #tpu.pipeline_mode<synchronous>, transform_indices = @transform_6, window_bounds = array<i64: 1, 128>}, {pipeline_mode = #tpu.pipeline_mode<synchronous>, transform_indices = @transform_7, window_bounds = array<i64: 1, 128>}, {transform_indices = @transform_8, window_bounds = array<i64: 1, 64, 128>}, {transform_indices = @transform_9, window_bounds = array<i64: 1, 64, 128>}, {transform_indices = @transform_10, window_bounds = array<i64: 1, 64, 128>}]} {
    %c0 = arith.constant 0 : index
    %c0_0 = arith.constant 0 : index
    %c0_1 = arith.constant 0 : index
    %0 = vector.load %arg2[%c0, %c0_0, %c0_1] : memref<1x64x128xf32, #tpu.memory_space<vmem>>, vector<1x64x128xf32>
    %1 = vector.shape_cast %0 : vector<1x64x128xf32> to vector<64x128xf32>
    %c0_2 = arith.constant 0 : index
    %c0_3 = arith.constant 0 : index
    %c0_4 = arith.constant 0 : index
    %2 = vector.load %arg3[%c0_2, %c0_3, %c0_4] : memref<1x2x128xf32, #tpu.memory_space<vmem>>, vector<1x2x128xf32>
    %3 = vector.shape_cast %2 : vector<1x2x128xf32> to vector<2x128xf32>
    %4 = vector.extract_strided_slice %3 {offsets = [0, 0], sizes = [1, 128], strides = [1, 1]} : vector<2x128xf32> to vector<1x128xf32>
    %5 = vector.extract_strided_slice %3 {offsets = [1, 0], sizes = [1, 128], strides = [1, 1]} : vector<2x128xf32> to vector<1x128xf32>
    %6 = vector.broadcast %4 : vector<1x128xf32> to vector<64x128xf32>
    %7 = arith.mulf %1, %6 : vector<64x128xf32>
    %8 = vector.broadcast %5 : vector<1x128xf32> to vector<64x128xf32>
    %9 = arith.addf %7, %8 : vector<64x128xf32>
    %10 = arith.truncf %9 : vector<64x128xf32> to vector<64x128xbf16>
    %c0_5 = arith.constant 0 : index
    %c0_6 = arith.constant 0 : index
    %11 = vector.load %arg4[%c0_5, %c0_6] : memref<128x128xbf16, #tpu.memory_space<vmem>>, vector<128x128xbf16>
    %cst = arith.constant dense<0.000000e+00> : vector<64x128xf32>
    %12 = tpu.matmul %10, %11, %cst {dimension_numbers = #tpu.dot_dimension_numbers<[1], [0], [0], [1], [0, 0, 1, 1], [], []>} : vector<64x128xbf16>, vector<128x128xbf16>, vector<64x128xf32> -> vector<64x128xf32>
    %c0_7 = arith.constant 0 : index
    %c0_8 = arith.constant 0 : index
    %13 = vector.load %arg7[%c0_7, %c0_8] : memref<1x128xf32, #tpu.memory_space<vmem>>, vector<1x128xf32>
    %14 = vector.broadcast %13 : vector<1x128xf32> to vector<64x128xf32>
    %15 = arith.addf %12, %14 : vector<64x128xf32>
    %16 = arith.truncf %15 : vector<64x128xf32> to vector<64x128xbf16>
    %c0_9 = arith.constant 0 : index
    %c0_10 = arith.constant 0 : index
    %c0_11 = arith.constant 0 : index
    %17 = vector.load %arg10[%c0_9, %c0_10, %c0_11] : memref<1x64x128xbf16, #tpu.memory_space<vmem>>, vector<1x64x128xbf16>
    %18 = vector.shape_cast %17 : vector<1x64x128xbf16> to vector<64x128xbf16>
    %19 = vector.shape_cast %16 : vector<64x128xbf16> to vector<1x64x128xbf16>
    tpu.vector_store %arg10[%c0_9, %c0_10, %c0_11], %19 {strides = array<i32>} : memref<1x64x128xbf16, #tpu.memory_space<vmem>>, vector<1x64x128xbf16>,
    %c0_12 = arith.constant 0 : index
    %c0_13 = arith.constant 0 : index
    %20 = vector.load %arg5[%c0_12, %c0_13] : memref<128x128xbf16, #tpu.memory_space<vmem>>, vector<128x128xbf16>
    %cst_14 = arith.constant dense<0.000000e+00> : vector<64x128xf32>
    %21 = tpu.matmul %10, %20, %cst_14 {dimension_numbers = #tpu.dot_dimension_numbers<[1], [0], [0], [1], [0, 0, 1, 1], [], []>} : vector<64x128xbf16>, vector<128x128xbf16>, vector<64x128xf32> -> vector<64x128xf32>
    %c0_15 = arith.constant 0 : index
    %c0_16 = arith.constant 0 : index
    %22 = vector.load %arg8[%c0_15, %c0_16] : memref<1x128xf32, #tpu.memory_space<vmem>>, vector<1x128xf32>
    %23 = vector.broadcast %22 : vector<1x128xf32> to vector<64x128xf32>
    %24 = arith.addf %21, %23 : vector<64x128xf32>
    %25 = arith.truncf %24 : vector<64x128xf32> to vector<64x128xbf16>
    %c0_17 = arith.constant 0 : index
    %c0_18 = arith.constant 0 : index
    %c0_19 = arith.constant 0 : index
    %26 = vector.load %arg11[%c0_17, %c0_18, %c0_19] : memref<1x64x128xbf16, #tpu.memory_space<vmem>>, vector<1x64x128xbf16>
    %27 = vector.shape_cast %26 : vector<1x64x128xbf16> to vector<64x128xbf16>
    %28 = vector.shape_cast %25 : vector<64x128xbf16> to vector<1x64x128xbf16>
    tpu.vector_store %arg11[%c0_17, %c0_18, %c0_19], %28 {strides = array<i32>} : memref<1x64x128xbf16, #tpu.memory_space<vmem>>, vector<1x64x128xbf16>,
    %c0_20 = arith.constant 0 : index
    %c0_21 = arith.constant 0 : index
    %29 = vector.load %arg6[%c0_20, %c0_21] : memref<128x128xbf16, #tpu.memory_space<vmem>>, vector<128x128xbf16>
    %cst_22 = arith.constant dense<0.000000e+00> : vector<64x128xf32>
    %30 = tpu.matmul %10, %29, %cst_22 {dimension_numbers = #tpu.dot_dimension_numbers<[1], [0], [0], [1], [0, 0, 1, 1], [], []>} : vector<64x128xbf16>, vector<128x128xbf16>, vector<64x128xf32> -> vector<64x128xf32>
    %c0_23 = arith.constant 0 : index
    %c0_24 = arith.constant 0 : index
    %31 = vector.load %arg9[%c0_23, %c0_24] : memref<1x128xf32, #tpu.memory_space<vmem>>, vector<1x128xf32>
    %32 = vector.broadcast %31 : vector<1x128xf32> to vector<64x128xf32>
    %33 = arith.addf %30, %32 : vector<64x128xf32>
    %34 = arith.truncf %33 : vector<64x128xf32> to vector<64x128xbf16>
    %c0_25 = arith.constant 0 : index
    %c0_26 = arith.constant 0 : index
    %c0_27 = arith.constant 0 : index
    %35 = vector.load %arg12[%c0_25, %c0_26, %c0_27] : memref<1x64x128xbf16, #tpu.memory_space<vmem>>, vector<1x64x128xbf16>
    %36 = vector.shape_cast %35 : vector<1x64x128xbf16> to vector<64x128xbf16>
    %37 = vector.shape_cast %34 : vector<64x128xbf16> to vector<1x64x128xbf16>
    tpu.vector_store %arg12[%c0_25, %c0_26, %c0_27], %37 {strides = array<i32>} : memref<1x64x128xbf16, #tpu.memory_space<vmem>>, vector<1x64x128xbf16>,
    return
  }
  func.func @transform_0(%arg0: i32, %arg1: i32) -> (i32, i32, i32) {
    %c0_i32 = arith.constant 0 : i32
    %c0_i32_0 = arith.constant 0 : i32
    return %arg0, %arg1, %c0_i32 : i32, i32, i32
  }
  func.func @transform_1(%arg0: i32, %arg1: i32) -> (i32, i32, i32) {
    %c0_i32 = arith.constant 0 : i32
    %c0_i32_0 = arith.constant 0 : i32
    %c0_i32_1 = arith.constant 0 : i32
    return %arg0, %c0_i32, %c0_i32_0 : i32, i32, i32
  }
  func.func @transform_2(%arg0: i32, %arg1: i32) -> (i32, i32) {
    %c0_i32 = arith.constant 0 : i32
    %c0_i32_0 = arith.constant 0 : i32
    %c0_i32_1 = arith.constant 0 : i32
    return %c0_i32, %c0_i32_0 : i32, i32
  }
  func.func @transform_3(%arg0: i32, %arg1: i32) -> (i32, i32) {
    %c0_i32 = arith.constant 0 : i32
    %c0_i32_0 = arith.constant 0 : i32
    %c0_i32_1 = arith.constant 0 : i32
    return %c0_i32, %c0_i32_0 : i32, i32
  }
  func.func @transform_4(%arg0: i32, %arg1: i32) -> (i32, i32) {
    %c0_i32 = arith.constant 0 : i32
    %c0_i32_0 = arith.constant 0 : i32
    %c0_i32_1 = arith.constant 0 : i32
    return %c0_i32, %c0_i32_0 : i32, i32
  }
  func.func @transform_5(%arg0: i32, %arg1: i32) -> (i32, i32) {
    %c0_i32 = arith.constant 0 : i32
    %c0_i32_0 = arith.constant 0 : i32
    %c0_i32_1 = arith.constant 0 : i32
    return %c0_i32, %c0_i32_0 : i32, i32
  }
  func.func @transform_6(%arg0: i32, %arg1: i32) -> (i32, i32) {
    %c0_i32 = arith.constant 0 : i32
    %c0_i32_0 = arith.constant 0 : i32
    %c0_i32_1 = arith.constant 0 : i32
    return %c0_i32, %c0_i32_0 : i32, i32
  }
  func.func @transform_7(%arg0: i32, %arg1: i32) -> (i32, i32) {
    %c0_i32 = arith.constant 0 : i32
    %c0_i32_0 = arith.constant 0 : i32
    %c0_i32_1 = arith.constant 0 : i32
    return %c0_i32, %c0_i32_0 : i32, i32
  }
  func.func @transform_8(%arg0: i32, %arg1: i32) -> (i32, i32, i32) {
    %c0_i32 = arith.constant 0 : i32
    %c0_i32_0 = arith.constant 0 : i32
    return %arg0, %arg1, %c0_i32 : i32, i32, i32
  }
  func.func @transform_9(%arg0: i32, %arg1: i32) -> (i32, i32, i32) {
    %c0_i32 = arith.constant 0 : i32
    %c0_i32_0 = arith.constant 0 : i32
    return %arg0, %arg1, %c0_i32 : i32, i32, i32
  }
  func.func @transform_10(%arg0: i32, %arg1: i32) -> (i32, i32, i32) {
    %c0_i32 = arith.constant 0 : i32
    %c0_i32_0 = arith.constant 0 : i32
    return %arg0, %arg1, %c0_i32 : i32, i32, i32
  }
}

module attributes {stable_mosaic.version = 11 : i64} {
  func.func @_attn_proj_kernel(%arg0: i32, %arg1: i32, %arg2: memref<1x64x128xf32, #tpu.memory_space<vmem>>, %arg3: memref<1x64x128xbf16, #tpu.memory_space<vmem>>, %arg4: memref<1x64x128xbf16, #tpu.memory_space<vmem>>, %arg5: memref<1x64x128xbf16, #tpu.memory_space<vmem>>, %arg6: memref<128x128xbf16, #tpu.memory_space<vmem>>, %arg7: memref<1x128xf32, #tpu.memory_space<vmem>>, %arg8: memref<1x64x128xf32, #tpu.memory_space<vmem>>) attributes {dimension_semantics = [#tpu.dimension_semantics<parallel>, #tpu.dimension_semantics<parallel>], iteration_bounds = array<i64: 2, 1>, scalar_prefetch = 0 : i64, scratch_operands = 0 : i64, tpu.core_type = #tpu.core_type<tc>, window_params = [{transform_indices = @transform_0, window_bounds = array<i64: 1, 64, 128>}, {transform_indices = @transform_1, window_bounds = array<i64: 1, 64, 128>}, {pipeline_mode = #tpu.pipeline_mode<synchronous>, transform_indices = @transform_2, window_bounds = array<i64: 1, 64, 128>}, {pipeline_mode = #tpu.pipeline_mode<synchronous>, transform_indices = @transform_3, window_bounds = array<i64: 1, 64, 128>}, {pipeline_mode = #tpu.pipeline_mode<synchronous>, transform_indices = @transform_4, window_bounds = array<i64: 128, 128>}, {pipeline_mode = #tpu.pipeline_mode<synchronous>, transform_indices = @transform_5, window_bounds = array<i64: 1, 128>}, {transform_indices = @transform_6, window_bounds = array<i64: 1, 64, 128>}]} {
    %c0 = arith.constant 0 : index
    %c0_0 = arith.constant 0 : index
    %c0_1 = arith.constant 0 : index
    %0 = vector.load %arg4[%c0, %c0_0, %c0_1] : memref<1x64x128xbf16, #tpu.memory_space<vmem>>, vector<1x64x128xbf16>
    %1 = vector.shape_cast %0 : vector<1x64x128xbf16> to vector<64x128xbf16>
    %c0_2 = arith.constant 0 : index
    %c0_3 = arith.constant 0 : index
    %c0_4 = arith.constant 0 : index
    %2 = vector.load %arg5[%c0_2, %c0_3, %c0_4] : memref<1x64x128xbf16, #tpu.memory_space<vmem>>, vector<1x64x128xbf16>
    %3 = vector.shape_cast %2 : vector<1x64x128xbf16> to vector<64x128xbf16>
    %c0_5 = arith.constant 0 : index
    %c0_6 = arith.constant 0 : index
    %4 = vector.load %arg6[%c0_5, %c0_6] : memref<128x128xbf16, #tpu.memory_space<vmem>>, vector<128x128xbf16>
    %c0_7 = arith.constant 0 : index
    %c0_8 = arith.constant 0 : index
    %5 = vector.load %arg7[%c0_7, %c0_8] : memref<1x128xf32, #tpu.memory_space<vmem>>, vector<1x128xf32>
    %c0_9 = arith.constant 0 : index
    %c0_10 = arith.constant 0 : index
    %c0_11 = arith.constant 0 : index
    %6 = vector.load %arg3[%c0_9, %c0_10, %c0_11] : memref<1x64x128xbf16, #tpu.memory_space<vmem>>, vector<1x64x128xbf16>
    %7 = vector.shape_cast %6 : vector<1x64x128xbf16> to vector<64x128xbf16>
    %c0_12 = arith.constant 0 : index
    %c0_13 = arith.constant 0 : index
    %c0_14 = arith.constant 0 : index
    %8 = vector.load %arg2[%c0_12, %c0_13, %c0_14] : memref<1x64x128xf32, #tpu.memory_space<vmem>>, vector<1x64x128xf32>
    %9 = vector.shape_cast %8 : vector<1x64x128xf32> to vector<64x128xf32>
    %cst = arith.constant dense<0.000000e+00> : vector<64x64xf32>
    %10 = tpu.matmul %7, %1, %cst {dimension_numbers = #tpu.dot_dimension_numbers<[1], [1], [0], [0], [0, 0, 1, 0], [], []>} : vector<64x128xbf16>, vector<64x128xbf16>, vector<64x64xf32> -> vector<64x64xf32>
    %cst_15 = arith.constant dense<0xFF800000> : vector<64xf32>
    %11 = vector.multi_reduction <maximumf>, %10, %cst_15 [1] : vector<64x64xf32> to vector<64xf32>
    %12 = vector.shape_cast %11 : vector<64xf32> to vector<64x1xf32>
    %13 = vector.broadcast %12 : vector<64x1xf32> to vector<64x64xf32>
    %14 = arith.subf %10, %13 : vector<64x64xf32>
    %15 = math.exp %14 : vector<64x64xf32>
    %cst_16 = arith.constant dense<0.000000e+00> : vector<64xf32>
    %16 = vector.multi_reduction <add>, %15, %cst_16 [1] : vector<64x64xf32> to vector<64xf32>
    %17 = vector.shape_cast %16 : vector<64xf32> to vector<64x1xf32>
    %18 = arith.truncf %15 : vector<64x64xf32> to vector<64x64xbf16>
    %cst_17 = arith.constant dense<0.000000e+00> : vector<64x128xf32>
    %19 = tpu.matmul %18, %3, %cst_17 {dimension_numbers = #tpu.dot_dimension_numbers<[1], [0], [0], [1], [0, 0, 1, 1], [], []>} : vector<64x64xbf16>, vector<64x128xbf16>, vector<64x128xf32> -> vector<64x128xf32>
    %20 = tpu.reciprocal %17 {approx = true} : vector<64x1xf32> -> vector<64x1xf32>
    %21 = vector.broadcast %20 : vector<64x1xf32> to vector<64x128xf32>
    %22 = arith.mulf %19, %21 : vector<64x128xf32>
    %23 = arith.truncf %22 : vector<64x128xf32> to vector<64x128xbf16>
    %cst_18 = arith.constant dense<0.000000e+00> : vector<64x128xf32>
    %24 = tpu.matmul %23, %4, %cst_18 {dimension_numbers = #tpu.dot_dimension_numbers<[1], [0], [0], [1], [0, 0, 1, 1], [], []>} : vector<64x128xbf16>, vector<128x128xbf16>, vector<64x128xf32> -> vector<64x128xf32>
    %25 = vector.broadcast %5 : vector<1x128xf32> to vector<64x128xf32>
    %26 = arith.addf %24, %25 : vector<64x128xf32>
    %27 = arith.addf %9, %26 : vector<64x128xf32>
    %c0_19 = arith.constant 0 : index
    %c0_20 = arith.constant 0 : index
    %c0_21 = arith.constant 0 : index
    %28 = vector.load %arg8[%c0_19, %c0_20, %c0_21] : memref<1x64x128xf32, #tpu.memory_space<vmem>>, vector<1x64x128xf32>
    %29 = vector.shape_cast %28 : vector<1x64x128xf32> to vector<64x128xf32>
    %30 = vector.shape_cast %27 : vector<64x128xf32> to vector<1x64x128xf32>
    tpu.vector_store %arg8[%c0_19, %c0_20, %c0_21], %30 {strides = array<i32>} : memref<1x64x128xf32, #tpu.memory_space<vmem>>, vector<1x64x128xf32>,
    return
  }
  func.func @transform_0(%arg0: i32, %arg1: i32) -> (i32, i32, i32) {
    %c0_i32 = arith.constant 0 : i32
    %c0_i32_0 = arith.constant 0 : i32
    return %arg0, %arg1, %c0_i32 : i32, i32, i32
  }
  func.func @transform_1(%arg0: i32, %arg1: i32) -> (i32, i32, i32) {
    %c0_i32 = arith.constant 0 : i32
    %c0_i32_0 = arith.constant 0 : i32
    return %arg0, %arg1, %c0_i32 : i32, i32, i32
  }
  func.func @transform_2(%arg0: i32, %arg1: i32) -> (i32, i32, i32) {
    %c0_i32 = arith.constant 0 : i32
    %c0_i32_0 = arith.constant 0 : i32
    %c0_i32_1 = arith.constant 0 : i32
    return %arg0, %c0_i32, %c0_i32_0 : i32, i32, i32
  }
  func.func @transform_3(%arg0: i32, %arg1: i32) -> (i32, i32, i32) {
    %c0_i32 = arith.constant 0 : i32
    %c0_i32_0 = arith.constant 0 : i32
    %c0_i32_1 = arith.constant 0 : i32
    return %arg0, %c0_i32, %c0_i32_0 : i32, i32, i32
  }
  func.func @transform_4(%arg0: i32, %arg1: i32) -> (i32, i32) {
    %c0_i32 = arith.constant 0 : i32
    %c0_i32_0 = arith.constant 0 : i32
    %c0_i32_1 = arith.constant 0 : i32
    return %c0_i32, %c0_i32_0 : i32, i32
  }
  func.func @transform_5(%arg0: i32, %arg1: i32) -> (i32, i32) {
    %c0_i32 = arith.constant 0 : i32
    %c0_i32_0 = arith.constant 0 : i32
    %c0_i32_1 = arith.constant 0 : i32
    return %c0_i32, %c0_i32_0 : i32, i32
  }
  func.func @transform_6(%arg0: i32, %arg1: i32) -> (i32, i32, i32) {
    %c0_i32 = arith.constant 0 : i32
    %c0_i32_0 = arith.constant 0 : i32
    return %arg0, %arg1, %c0_i32 : i32, i32, i32
  }
}

</mosaic_0001>

<bundles_post_ra>
// kernel: squeeze.2
= control target key start
LH: loop header
LB: loop body
LE: loop exit
PB: predicated region body
PF: predicated region fallthrough
CT: control target
= control target key end

     0   :  { %s354_s8 = smov 116   ;;  %s355_s9 = smov 120   ;;  %vm7_vm0 = vcmask 31744   ;;  %s653_s0 = inlined_call_operand.vmem [shape: f32[2,128], index: 0, kind: input, shape index: {}]   ;;  %s654_s1 = inlined_call_operand.vmem [shape: f32[2,32,4], index: 1, kind: output, shape index: {}]  }
   0x1   :  { %v4_v0 = vld [vmem:[%s653_s0] sm:$0x3]  ;;  %s353_s0 = smov 124   ;;  %s356_s10 = smov 112  }
   0x2   :  { %5 = vst [vmem:[#allocation0] sm:$0x3] %v4_v0  ;;  %s357_s11 = smov 108   ;;  %s358_s12 = smov 104  }
   0x3   :  { %s359_s13 = smov 100   ;;  %s360_s14 = smov 96  }
   0x4   :  { %s361_s15 = smov 92   ;;  %s362_s16 = smov 88  }
   0x5   :  { %s363_s17 = smov 84   ;;  %s364_s18 = smov 80  }
   0x6   :  { %s365_s19 = smov 76   ;;  %s366_s20 = smov 72  }
   0x7   :  { %s367_s21 = smov 68   ;;  %s368_s22 = smov 64  }
   0x8   :  { %s369_s23 = smov 60   ;;  %s370_s24 = smov 56  }
   0x9   :  { %v11_v1 = vld [vmem:[#allocation0] sm:$0x3]   ;;  %s371_s25 = smov 52   ;;  %s372_s26 = smov 48  }
   0xa   :  { %v27_v2 = vld [vmem:[#allocation0] sm:$0x3]   ;;  %12 = vrot.lane.b32.xlu0 %v11_v1, %s353_s0  ;;  %s373_s27 = smov 44   ;;  %s374_s28 = smov 40  }
   0xb   :  { %28 = vrot.lane.b32.xlu1 %v27_v2, %s354_s8  ;;  %v19_v3 = vld [vmem:[#allocation0] sm:$0x3]   ;;  %s375_s29 = smov 36   ;;  %s376_s30 = smov 32  }
   0xc   :  { %v35_v4 = vld [vmem:[#allocation0] sm:$0x3]   ;;  %s377_s6 = smov 28   ;;  %s378_s7 = smov 24  }
   0xd   :  { %v43_v5 = vld [vmem:[#allocation0] sm:$0x3]   ;;  %s379_s0 = smov 20   ;;  %s380_s8 = smov 16  }
   0xe   :  { %20 = vrot.lane.b32.xlu0 %v19_v3, %s355_s9  ;;  %v51_v6 = vld [vmem:[#allocation0] sm:$0x3]   ;;  %s381_s9 = smov 12  }
   0xf   :  { %36 = vrot.lane.b32.xlu1 %v35_v4, %s356_s10  ;;  %v59_v7 = vld [vmem:[#allocation0] sm:$0x3]   ;;  %s382_s10 = smov 8  }
  0x10   :  { %v67_v8 = vld [vmem:[#allocation0] sm:$0x3]  }
  0x11   :  { %v75_v9 = vld [vmem:[#allocation0] sm:$0x3]  }
  0x12   :  { %44 = vrot.lane.b32.xlu0 %v43_v5, %s357_s11  ;;  %v83_v10 = vld [vmem:[#allocation0] sm:$0x3]   ;;  %s383_s11 = smov 4  }
  0x13   :  { %52 = vrot.lane.b32.xlu1 %v51_v6, %s358_s12  ;;  %v91_v11 = vld [vmem:[#allocation0] sm:$0x3]  }
  0x14   :  { %v99_v12 = vld [vmem:[#allocation0] sm:$0x3]  }
  0x15   :  { %v107_v13 = vld [vmem:[#allocation0] sm:$0x3]  }
  0x16   :  { %60 = vrot.lane.b32.xlu0 %v59_v7, %s359_s13  ;;  %v115_v14 = vld [vmem:[#allocation0] sm:$0x3]  }
  0x17   :  { %68 = vrot.lane.b32.xlu1 %v67_v8, %s360_s14  ;;  %v123_v15 = vld [vmem:[#allocation0] sm:$0x3]  }
  0x18   :  { %v131_v16 = vld [vmem:[#allocation0] sm:$0x3]  }
  0x19   :  { %v139_v17 = vld [vmem:[#allocation0] sm:$0x3]  }
  0x1a   :  { %76 = vrot.lane.b32.xlu0 %v75_v9, %s361_s15  ;;  %v147_v18 = vld [vmem:[#allocation0] sm:$0x3]  }
  0x1b   :  { %84 = vrot.lane.b32.xlu1 %v83_v10, %s362_s16  ;;  %v155_v19 = vld [vmem:[#allocation0] sm:$0x3]  }
  0x1c   :  { %v163_v20 = vld [vmem:[#allocation0] sm:$0x3]  }
  0x1d   :  { %v171_v21 = vld [vmem:[#allocation0] sm:$0x3]  }
  0x1e   :  { %92 = vrot.lane.b32.xlu0 %v91_v11, %s363_s17  ;;  %v179_v22 = vld [vmem:[#allocation0] sm:$0x3]  }
  0x1f   :  { %100 = vrot.lane.b32.xlu1 %v99_v12, %s364_s18  ;;  %v187_v23 = vld [vmem:[#allocation0] sm:$0x3]  }
  0x20   :  { %v195_v24 = vld [vmem:[#allocation0] sm:$0x3]  }
  0x21   :  { %v203_v25 = vld [vmem:[#allocation0] sm:$0x3]  }
  0x22   :  { %108 = vrot.lane.b32.xlu0 %v107_v13, %s365_s19  ;;  %v211_v26 = vld [vmem:[#allocation0] sm:$0x3]  }
  0x23   :  { %116 = vrot.lane.b32.xlu1 %v115_v14, %s366_s20  ;;  %v6_v27 = vld [vmem:[#allocation0] sm:$0x3]  }
  0x24   :  { %8 = vst.msk [vmem:[%s654_s1] sm:$0x1] %vm7_vm0, %v6_v27   ;;  %259 = vst.msk [vmem:[%s654_s1 + $0x1f] sm:$0x2] %vm7_vm0, %v6_v27   ;;  %v219_v28 = vld [vmem:[#allocation0] sm:$0x3]  }
  0x25   :  { %v227_v29 = vld [vmem:[#allocation0] sm:$0x3]  }
  0x26   :  { %124 = vrot.lane.b32.xlu0 %v123_v15, %s367_s21  ;;  %v235_v30 = vld [vmem:[#allocation0] sm:$0x3]  }
  0x27   :  { %132 = vrot.lane.b32.xlu1 %v131_v16, %s368_s22  ;;  %v243_v31 = vld [vmem:[#allocation0] sm:$0x3]  }
  0x28   :  { %v251_v32 = vld [vmem:[#allocation0] sm:$0x3]  }
  0x2a   :  { %140 = vrot.lane.b32.xlu0 %v139_v17, %s369_s23 }
  0x2b   :  { %148 = vrot.lane.b32.xlu1 %v147_v18, %s370_s24 }
  0x2e   :  { %156 = vrot.lane.b32.xlu0 %v155_v19, %s371_s25 }
  0x2f   :  { %164 = vrot.lane.b32.xlu1 %v163_v20, %s372_s26 }
  0x32   :  { %172 = vrot.lane.b32.xlu0 %v171_v21, %s373_s27 }
  0x33   :  { %180 = vrot.lane.b32.xlu1 %v179_v22, %s374_s28 }
  0x36   :  { %188 = vrot.lane.b32.xlu0 %v187_v23, %s375_s29 }
  0x37   :  { %196 = vrot.lane.b32.xlu1 %v195_v24, %s376_s30 }
  0x3a   :  { %204 = vrot.lane.b32.xlu0 %v203_v25, %s377_s6 }
  0x3b   :  { %212 = vrot.lane.b32.xlu1 %v211_v26, %s378_s7 }
  0x3e   :  { %220 = vrot.lane.b32.xlu0 %v219_v28, %s379_s0 }
  0x3f   :  { %228 = vrot.lane.b32.xlu1 %v227_v29, %s380_s8 }
  0x42   :  { %236 = vrot.lane.b32.xlu0 %v235_v30, %s381_s9 }
  0x43   :  { %244 = vrot.lane.b32.xlu1 %v243_v31, %s382_s10 }
  0x46   :  { %252 = vrot.lane.b32.xlu0 %v251_v32, %s383_s11 }
  0x7c   :  { %v13_v33 = vpop.permute.xlu0 %12  }
  0x7d   :  { %v29_v34 = vpop.permute.xlu1 %28   ;;  %260 = vst.msk [vmem:[%s654_s1 + $0x1] sm:$0x1] %vm7_vm0, %v13_v33   ;;  %261 = vst.msk [vmem:[%s654_s1 + $0x20] sm:$0x2] %vm7_vm0, %v13_v33  }
  0x7e   :  { %264 = vst.msk [vmem:[%s654_s1 + $0x3] sm:$0x1] %vm7_vm0, %v29_v34   ;;  %265 = vst.msk [vmem:[%s654_s1 + $0x22] sm:$0x2] %vm7_vm0, %v29_v34  }
  0x80   :  { %v21_v35 = vpop.permute.xlu0 %20  }
  0x81   :  { %v37_v36 = vpop.permute.xlu1 %36   ;;  %262 = vst.msk [vmem:[%s654_s1 + $0x2] sm:$0x1] %vm7_vm0, %v21_v35   ;;  %263 = vst.msk [vmem:[%s654_s1 + $0x21] sm:$0x2] %vm7_vm0, %v21_v35  }
  0x82   :  { %266 = vst.msk [vmem:[%s654_s1 + $0x4] sm:$0x1] %vm7_vm0, %v37_v36   ;;  %267 = vst.msk [vmem:[%s654_s1 + $0x23] sm:$0x2] %vm7_vm0, %v37_v36  }
  0x84   :  { %v45_v37 = vpop.permute.xlu0 %44  }
  0x85   :  { %v53_v38 = vpop.permute.xlu1 %52   ;;  %268 = vst.msk [vmem:[%s654_s1 + $0x5] sm:$0x1] %vm7_vm0, %v45_v37   ;;  %269 = vst.msk [vmem:[%s654_s1 + $0x24] sm:$0x2] %vm7_vm0, %v45_v37  }
  0x86   :  { %270 = vst.msk [vmem:[%s654_s1 + $0x6] sm:$0x1] %vm7_vm0, %v53_v38   ;;  %271 = vst.msk [vmem:[%s654_s1 + $0x25] sm:$0x2] %vm7_vm0, %v53_v38  }
  0x88   :  { %v61_v39 = vpop.permute.xlu0 %60  }
  0x89   :  { %v69_v40 = vpop.permute.xlu1 %68   ;;  %272 = vst.msk [vmem:[%s654_s1 + $0x7] sm:$0x1] %vm7_vm0, %v61_v39   ;;  %273 = vst.msk [vmem:[%s654_s1 + $0x26] sm:$0x2] %vm7_vm0, %v61_v39  }
  0x8a   :  { %274 = vst.msk [vmem:[%s654_s1 + $0x8] sm:$0x1] %vm7_vm0, %v69_v40   ;;  %275 = vst.msk [vmem:[%s654_s1 + $0x27] sm:$0x2] %vm7_vm0, %v69_v40  }
  0x8c   :  { %v77_v41 = vpop.permute.xlu0 %76  }
  0x8d   :  { %v85_v42 = vpop.permute.xlu1 %84   ;;  %276 = vst.msk [vmem:[%s654_s1 + $0x9] sm:$0x1] %vm7_vm0, %v77_v41   ;;  %277 = vst.msk [vmem:[%s654_s1 + $0x28] sm:$0x2] %vm7_vm0, %v77_v41  }
  0x8e   :  { %278 = vst.msk [vmem:[%s654_s1 + $0xa] sm:$0x1] %vm7_vm0, %v85_v42   ;;  %279 = vst.msk [vmem:[%s654_s1 + $0x29] sm:$0x2] %vm7_vm0, %v85_v42  }
  0x90   :  { %v93_v43 = vpop.permute.xlu0 %92  }
  0x91   :  { %v101_v44 = vpop.permute.xlu1 %100   ;;  %280 = vst.msk [vmem:[%s654_s1 + $0xb] sm:$0x1] %vm7_vm0, %v93_v43   ;;  %281 = vst.msk [vmem:[%s654_s1 + $0x2a] sm:$0x2] %vm7_vm0, %v93_v43  }
  0x92   :  { %282 = vst.msk [vmem:[%s654_s1 + $0xc] sm:$0x1] %vm7_vm0, %v101_v44   ;;  %283 = vst.msk [vmem:[%s654_s1 + $0x2b] sm:$0x2] %vm7_vm0, %v101_v44  }
  0x94   :  { %v109_v45 = vpop.permute.xlu0 %108  }
  0x95   :  { %v117_v46 = vpop.permute.xlu1 %116   ;;  %284 = vst.msk [vmem:[%s654_s1 + $0xd] sm:$0x1] %vm7_vm0, %v109_v45   ;;  %285 = vst.msk [vmem:[%s654_s1 + $0x2c] sm:$0x2] %vm7_vm0, %v109_v45  }
  0x96   :  { %286 = vst.msk [vmem:[%s654_s1 + $0xe] sm:$0x1] %vm7_vm0, %v117_v46   ;;  %287 = vst.msk [vmem:[%s654_s1 + $0x2d] sm:$0x2] %vm7_vm0, %v117_v46  }
  0x98   :  { %v125_v47 = vpop.permute.xlu0 %124  }
  0x99   :  { %v133_v48 = vpop.permute.xlu1 %132   ;;  %288 = vst.msk [vmem:[%s654_s1 + $0xf] sm:$0x1] %vm7_vm0, %v125_v47   ;;  %289 = vst.msk [vmem:[%s654_s1 + $0x2e] sm:$0x2] %vm7_vm0, %v125_v47  }
  0x9a   :  { %290 = vst.msk [vmem:[%s654_s1 + $0x10] sm:$0x1] %vm7_vm0, %v133_v48   ;;  %291 = vst.msk [vmem:[%s654_s1 + $0x2f] sm:$0x2] %vm7_vm0, %v133_v48  }
  0x9c   :  { %v141_v49 = vpop.permute.xlu0 %140  }
  0x9d   :  { %v149_v50 = vpop.permute.xlu1 %148   ;;  %292 = vst.msk [vmem:[%s654_s1 + $0x11] sm:$0x1] %vm7_vm0, %v141_v49   ;;  %293 = vst.msk [vmem:[%s654_s1 + $0x30] sm:$0x2] %vm7_vm0, %v141_v49  }
  0x9e   :  { %294 = vst.msk [vmem:[%s654_s1 + $0x12] sm:$0x1] %vm7_vm0, %v149_v50   ;;  %295 = vst.msk [vmem:[%s654_s1 + $0x31] sm:$0x2] %vm7_vm0, %v149_v50  }
  0xa0   :  { %v157_v51 = vpop.permute.xlu0 %156  }
  0xa1   :  { %v165_v52 = vpop.permute.xlu1 %164   ;;  %296 = vst.msk [vmem:[%s654_s1 + $0x13] sm:$0x1] %vm7_vm0, %v157_v51   ;;  %297 = vst.msk [vmem:[%s654_s1 + $0x32] sm:$0x2] %vm7_vm0, %v157_v51  }
  0xa2   :  { %298 = vst.msk [vmem:[%s654_s1 + $0x14] sm:$0x1] %vm7_vm0, %v165_v52   ;;  %299 = vst.msk [vmem:[%s654_s1 + $0x33] sm:$0x2] %vm7_vm0, %v165_v52  }
  0xa4   :  { %v173_v53 = vpop.permute.xlu0 %172  }
  0xa5   :  { %v181_v54 = vpop.permute.xlu1 %180   ;;  %300 = vst.msk [vmem:[%s654_s1 + $0x15] sm:$0x1] %vm7_vm0, %v173_v53   ;;  %301 = vst.msk [vmem:[%s654_s1 + $0x34] sm:$0x2] %vm7_vm0, %v173_v53  }
  0xa6   :  { %302 = vst.msk [vmem:[%s654_s1 + $0x16] sm:$0x1] %vm7_vm0, %v181_v54   ;;  %303 = vst.msk [vmem:[%s654_s1 + $0x35] sm:$0x2] %vm7_vm0, %v181_v54  }
  0xa8   :  { %v189_v55 = vpop.permute.xlu0 %188  }
  0xa9   :  { %v197_v56 = vpop.permute.xlu1 %196   ;;  %304 = vst.msk [vmem:[%s654_s1 + $0x17] sm:$0x1] %vm7_vm0, %v189_v55   ;;  %305 = vst.msk [vmem:[%s654_s1 + $0x36] sm:$0x2] %vm7_vm0, %v189_v55  }
  0xaa   :  { %306 = vst.msk [vmem:[%s654_s1 + $0x18] sm:$0x1] %vm7_vm0, %v197_v56   ;;  %307 = vst.msk [vmem:[%s654_s1 + $0x37] sm:$0x2] %vm7_vm0, %v197_v56  }
  0xac   :  { %v205_v57 = vpop.permute.xlu0 %204  }
  0xad   :  { %v213_v58 = vpop.permute.xlu1 %212   ;;  %308 = vst.msk [vmem:[%s654_s1 + $0x19] sm:$0x1] %vm7_vm0, %v205_v57   ;;  %309 = vst.msk [vmem:[%s654_s1 + $0x38] sm:$0x2] %vm7_vm0, %v205_v57  }
  0xae   :  { %310 = vst.msk [vmem:[%s654_s1 + $0x1a] sm:$0x1] %vm7_vm0, %v213_v58   ;;  %311 = vst.msk [vmem:[%s654_s1 + $0x39] sm:$0x2] %vm7_vm0, %v213_v58  }
  0xb0   :  { %v221_v59 = vpop.permute.xlu0 %220  }
  0xb1   :  { %v229_v60 = vpop.permute.xlu1 %228   ;;  %312 = vst.msk [vmem:[%s654_s1 + $0x1b] sm:$0x1] %vm7_vm0, %v221_v59   ;;  %313 = vst.msk [vmem:[%s654_s1 + $0x3a] sm:$0x2] %vm7_vm0, %v221_v59  }
  0xb2   :  { %314 = vst.msk [vmem:[%s654_s1 + $0x1c] sm:$0x1] %vm7_vm0, %v229_v60   ;;  %315 = vst.msk [vmem:[%s654_s1 + $0x3b] sm:$0x2] %vm7_vm0, %v229_v60  }
  0xb4   :  { %v237_v61 = vpop.permute.xlu0 %236  }
  0xb5   :  { %v245_v62 = vpop.permute.xlu1 %244   ;;  %316 = vst.msk [vmem:[%s654_s1 + $0x1d] sm:$0x1] %vm7_vm0, %v237_v61   ;;  %317 = vst.msk [vmem:[%s654_s1 + $0x3c] sm:$0x2] %vm7_vm0, %v237_v61  }
  0xb6   :  { %318 = vst.msk [vmem:[%s654_s1 + $0x1e] sm:$0x1] %vm7_vm0, %v245_v62   ;;  %319 = vst.msk [vmem:[%s654_s1 + $0x3d] sm:$0x2] %vm7_vm0, %v245_v62  }
  0xb8   :  { %v253_v63 = vpop.permute.xlu0 %252  }
  0xb9   :  { %320 = vst.msk [vmem:[%s654_s1 + $0x1f] sm:$0x1] %vm7_vm0, %v253_v63   ;;  %321 = vst.msk [vmem:[%s654_s1 + $0x3e] sm:$0x2] %vm7_vm0, %v253_v63  }

// kernel: _attn_block_impl.3
= control target key start
LH: loop header
LB: loop body
LE: loop exit
PB: predicated region body
PF: predicated region fallthrough
CT: control target
= control target key end

     0   :  { %6 = vsyncpa [#allocation3], 0  ;;  %s576_s0 = inlined_call_operand.hbm [shape: f32[2,64,128], index: 0, kind: input, shape index: {}]   ;;  %s577_s1 = inlined_call_operand.vmem [shape: f32[2,2,128], index: 1, kind: output, shape index: {}]  }
   0x1   :  { %8 = vsyncpa [#allocation3 + $0x1], 0  ;;  %s447_s6 = smov 0   ;;  %s449_s7 = smov 0  }
   0x2   :  { %s451_s8 = smov 0   ;;  %s453_s9 = smov 0  }
   0x3   :  { %s455_s10 = smov 0   ;;  %s457_s11 = smov 0  }
   0x4 LB: > { %s280_s12 = sadd.s32 4294967295, %s431_s11   ;;  %s26_s13 = sadd.s32 1, %s427_s10  ;;  %s431_s11 = sphi %s457_s11, %s14_s11   ;;  %s427_s10 = sphi %s455_s10, %s585_s10   ;;  %s423_s9 = sphi %s453_s9, %s584_s9   ;;  %s419_s8 = sphi %s451_s8, %s583_s8   ;;  %s415_s7 = sphi %s449_s7, %s582_s7   ;;  %s411_s6 = sphi %s447_s6, %s581_s6  }
   0x5   : > { %p28_p0 = scmp.ge.s32.totalorder %s26_s13, 2  ;;  %s35_s14 = sadd.s32 1, %s419_s8 }
   0x6   : > { %p42_p1 = scmp.ne.s32.totalorder %s419_s8, %s415_s7  ;;  %p43_p2 = scmp.eq.s32.totalorder %s431_s11, 0 }
   0x7   : > { %s587_s13 = smov (%p28_p0, %s26_s13), 0  ;;  %p48_p4 = scmp.ne.s32.totalorder %s415_s7, %s411_s6 }
   0x8   : > { %p483_p3 = por %p43_p2, %p42_p1  ;;  %s30_s16 = ssub.s32 %s427_s10, %s587_s13 }
   0x9   : > { %p49_p5 = scmp.eq.s32.totalorder %s280_s12, 0  ;;  %p33_p6 = scmp.eq.s32.totalorder %s30_s16, 0 }
   0xa   : > { %p299_p8 = scmp.lt.s32.totalorder %s431_s11, 2  ;;  %s98_s19 = sand.u32 1, %s419_s8  }
   0xb   : > { %p490_p7 = por %p49_p5, %p48_p4  ;;  %s292_s20 = sshll.u32 %s427_s10, 10 }
   0xc   : > { %s496_s18 = scalar_select %p33_p6, %s419_s8, %s35_s14  }
   0xd   : > { %s284_s21 = sshll.u32 %s98_s19, 6  ;;  %s503_s24 = scalar_lea.hbm %s576_s0, %s292_s20 }
   0xe   : > { %s102_s25 = scalar_lea.vmem [#allocation2], %s284_s21  ;;  %p507_p9 = pnand %p299_p8, %p483_p3 }
   0xf   : > { %s111_s26 = sshll.u32 %s102_s25, 4  ;;  %s513_s28 = scalar_lea.sflag [#allocation3], %s98_s19  ;;  %s511_s26 = int_to_ptr.vmem [resolvable:$true] %s111_s26 }
  0x10   : > { %s351_s29 = scalar_lea.hbm %s503_s24, 1024  ;;  %p353_p11 = pneg %p507_p9 }
  0x11   : > { %p352_p10 = scmp.ne.s32.totalorder %s503_s24, %s351_s29  ;;  %s356_s3 = scalar_lea.hbm %s576_s0, 2048 }
  0x12   : > { %p357_p0 = scmp.lt.u32.totalorder %s503_s24, %s576_s0  ;;  %p358_p1 = scmp.lt.u32.totalorder %s356_s3, %s351_s29 }
  0x13   : > { %p354_p12 = pnand %p353_p11, %p352_p10  ;;  %p360_p3 = scmp.lt.u32.totalorder %s351_s29, %s503_s24 }
  0x14   : > { %p359_p2 = por %p358_p1, %p357_p0 }
  0x15   : > { %p355_p13 = pneg %p354_p12 }
  0x16   : > { %p361_p4 = por %p360_p3, %p359_p2 }
  0x18   : > { %p362_p5 = pnand %p361_p4, %p355_p13 }
  0x1a   : > { %365 = shalt.err (!%p362_p5)
}
  0x1b   : > { %s366_s6 = scalar_lea.vmem %s511_s26, 1024  ;;  %s433_s12 = smov [#allocation2]  }
  0x1c   : > { %p367_p6 = scmp.ne.s32.totalorder %s511_s26, %s366_s6  ;;  %s371_s14 = sshll.u32 %s433_s12, 4  ;;  %s372_s14 = int_to_ptr.vmem [resolvable:$false] %s371_s14 }
  0x1d   : > { %s373_s15 = scalar_lea.vmem %s372_s14, 2048  ;;  %p374_p12 = scmp.lt.s32.totalorder %s511_s26, %s372_s14 }
  0x1e   : > { %p369_p8 = pnand %p367_p6, %p353_p11  ;;  %p375_p0 = scmp.lt.s32.totalorder %s373_s15, %s366_s6 }
  0x20   : > { %p370_p10 = pneg %p369_p8  ;;  %p376_p1 = por %p375_p0, %p374_p12 }
  0x22   : > { %p377_p2 = pnand %p376_p1, %p370_p10 }
  0x24   : > { %380 = shalt.err (!%p377_p2)
}
  0x25   : > { %s434_s16 = smov 128   ;;  %s435_s19 = smov 8  }
  0x26   : > { %298 = dma.hbm_to_vmem [thread:$0]  (!%p507_p9), %s503_s24, 1024, %s511_s26, %s513_s28, %s434_s16, %s434_s16, %s435_s19  }
  0x27   : > { %p287_p11 = scmp.ge.s32.totalorder %s431_s11, 1  ;;  %p119_p13 = scmp.lt.s32.totalorder %s431_s11, 3 }
  0x29   : > { %p120_p3 = pnand %p287_p11, %p119_p13 }
  0x2a   : > { %s125_s20 = sand.u32 (!%p120_p3), 1, %s415_s7  }
  0x2b   : > { %123 = sbr.rel (%p120_p3) target bundleno = 84 (0x54), region = 24  ;;  %s288_s21 = sshll.u32 (!%p120_p3), %s125_s20, 6 }
  0x2c   : > { %s126_s22 = scalar_lea.sflag (!%p120_p3), [#allocation3], %s125_s20  ;;  %s129_s23 = scalar_lea.vmem (!%p120_p3), [#allocation2], %s288_s21 }
  0x32   : > { %406 = dma.done.wait (%p490_p7), %s126_s22, 1024  }
  0x33   : > { %408 = vsyncadd (%p490_p7), %s126_s22, 4294966272  ;;  %p148_p4 = scmp.lt.s32.totalorder %s423_s9, 1  ;;  %v436_v0 = vmov 0.0   ;;  %v157_v1 = vld [vmem:[%s129_s23] sm:$0xff]  ;;  %v158_v2 = vld [vmem:[%s129_s23 + $0x8] sm:$0xff]  ;;  %vm200_vm0 = vcmask 1040384  }
  0x34   : > { %v159_v3 = vld [vmem:[%s129_s23 + $0x10] sm:$0xff]  ;;  %v160_v4 = vld [vmem:[%s129_s23 + $0x18] sm:$0xff]  ;;  %v165_v5 = vadd.f32 %v158_v2, %v157_v1  ;;  %v178_v6 = vmul.f32 %v157_v1, %v157_v1  ;;  %v179_v7 = vmul.f32 %v158_v2, %v158_v2  ;;  %v161_v9 = vld [vmem:[%s129_s23 + $0x20] sm:$0xff] }
  0x35   : > { %s589_s9 = smov (!%p148_p4, %s423_s9), 1  ;;  %v180_v8 = vmul.f32 %v159_v3, %v159_v3  ;;  %v181_v11 = vmul.f32 %v160_v4, %v160_v4  ;;  %v162_v13 = vld [vmem:[%s129_s23 + $0x28] sm:$0xff]  ;;  %v182_v15 = vmul.f32 %v161_v9, %v161_v9  ;;  %v163_v17 = vld [vmem:[%s129_s23 + $0x30] sm:$0xff]  ;;  %v164_v21 = vld [vmem:[%s129_s23 + $0x38] sm:$0xff] }
  0x36   : > { %s289_s24 = sshll.u32 %s589_s9, 1  ;;  %v166_v10 = vadd.f32 %v165_v5, %v159_v3  ;;  %v186_v12 = vadd.f32 %v179_v7, %v178_v6  ;;  %v183_v19 = vmul.f32 %v162_v13, %v162_v13  ;;  %v184_v23 = vmul.f32 %v163_v17, %v163_v17 }
  0x37   : > { %s553_s27 = scalar_lea.vmem %s577_s1, %s289_s24  ;;  %v185_v26 = vmul.f32 %v164_v21, %v164_v21 }
  0x38   : > { %156 = vst [vmem:[%s553_s27] sm:$0x3] %v436_v0  ;;  %v167_v14 = vadd.f32 %v166_v10, %v160_v4  ;;  %v187_v16 = vadd.f32 %v186_v12, %v180_v8 }
  0x3a   : > { %v168_v18 = vadd.f32 %v167_v14, %v161_v9  ;;  %v188_v20 = vadd.f32 %v187_v16, %v181_v11 }
  0x3c   : > { %v169_v22 = vadd.f32 %v168_v18, %v162_v13  ;;  %v189_v24 = vadd.f32 %v188_v20, %v182_v15 }
  0x3e   : > { %v170_v25 = vadd.f32 %v169_v22, %v163_v17  ;;  %v190_v27 = vadd.f32 %v189_v24, %v183_v19 }
  0x3f   : > { %v199_v43 = vld [vmem:[%s553_s27] sm:$0x3] }
  0x40   : > { %v171_v28 = vadd.f32 %v170_v25, %v164_v21  ;;  %v191_v29 = vadd.f32 %v190_v27, %v184_v23 }
  0x42   : > { %v172_v30 = vrot.slane %v171_v28, 4  ;;  %v192_v31 = vadd.f32 %v191_v29, %v185_v26 }
  0x44   : > { %v173_v32 = vadd.f32 %v172_v30, %v171_v28  ;;  %v193_v33 = vrot.slane %v192_v31, 4 }
  0x46   : > { %v174_v34 = vrot.slane %v173_v32, 2  ;;  %v194_v35 = vadd.f32 %v193_v33, %v192_v31 }
  0x48   : > { %v175_v36 = vadd.f32 %v174_v34, %v173_v32  ;;  %v195_v37 = vrot.slane %v194_v35, 2 }
  0x4a   : > { %v176_v38 = vrot.slane %v175_v36, 1  ;;  %v196_v39 = vadd.f32 %v195_v37, %v194_v35 }
  0x4c   : > { %v177_v40 = vadd.f32 %v176_v38, %v175_v36  ;;  %v197_v41 = vrot.slane %v196_v39, 1 }
  0x4e   : > { %v198_v42 = vadd.f32 %v197_v41, %v196_v39 }
  0x50   : > { %v201_v44 = vsel %vm200_vm0, %v177_v40, %v198_v42 }
  0x51   : > { %v202_v45 = vadd.f32 %v201_v44, %v199_v43 }
  0x53   : > { %203 = vst [vmem:[%s553_s27] sm:$0x3] %v202_v45 }
  0x54 PF: > { %s14_s11 = sadd.s32 1, %s431_s11   ;;  %s581_s6 = smov %s415_s7 }
  0x55   : > { %p11_p7 = scmp.ge.s32.totalorder %s14_s11, 4   ;;  %s582_s7 = smov %s419_s8 }
  0x56   : > { %s583_s8 = smov %s496_s18  ;;  %s584_s9 = smov %s427_s10 }
  0x57   : > { %s585_s10 = smov %s587_s13  ;;  %13 = sbr.rel (!%p11_p7) target bundleno = 4 (0x4), region = 68 }
  0x5e   :  { %223 = vsyncpa [#allocation3], 1 }
  0x5f   :  { %225 = vsyncpa [#allocation3 + $0x1], 1 }

// kernel: _attn_block_impl.4
= control target key start
LH: loop header
LB: loop body
LE: loop exit
PB: predicated region body
PF: predicated region fallthrough
CT: control target
= control target key end

     0   :  { %s1643_s13 = smov 0   ;;  %s1645_s14 = smov 0   ;;  %s1798_s0 = inlined_call_operand.vmem [shape: f32[2,64,128], index: 0, kind: input, shape index: {}]   ;;  %s1799_s1 = inlined_call_operand.vmem [shape: f32[2,2,128], index: 1, kind: input, shape index: {}]   ;;  %s1800_s2 = inlined_call_operand.vmem [shape: bf16[128,128], index: 2, kind: input, shape index: {}]   ;;  %s1801_s3 = inlined_call_operand.vmem [shape: bf16[128,128], index: 3, kind: input, shape index: {}]   ;;  %s1802_s4 = inlined_call_operand.vmem [shape: bf16[128,128], index: 4, kind: input, shape index: {}]   ;;  %s1803_s5 = inlined_call_operand.vmem [shape: f32[1,128], index: 5, kind: input, shape index: {}]   ;;  %s1804_s6 = inlined_call_operand.vmem [shape: f32[1,128], index: 6, kind: input, shape index: {}]   ;;  %s1805_s7 = inlined_call_operand.vmem [shape: f32[1,128], index: 7, kind: input, shape index: {}]   ;;  %s1806_s8 = inlined_call_operand.vmem [shape: bf16[2,64,128], index: 8, kind: output, shape index: {0}]   ;;  %s1807_s9 = inlined_call_operand.vmem [shape: bf16[2,64,128], index: 9, kind: output, shape index: {1}]   ;;  %s1808_s10 = inlined_call_operand.vmem [shape: bf16[2,64,128], index: 10, kind: output, shape index: {2}]  }
   0x1   :  { %s1647_s15 = smov 0  }
   0x2 LB: > { %s33_s16 = sadd.s32 1, %s1582_s14  ;;  %p1232_p0 = scmp.ge.s32.totalorder %s1586_s15, 1  ;;  %s1586_s15 = sphi %s1647_s15, %s21_s15   ;;  %s1582_s14 = sphi %s1645_s14, %s1810_s14   ;;  %s1578_s13 = sphi %s1643_s13, %s1809_s13  }
   0x3   : > { %p35_p1 = scmp.ge.s32.totalorder %s33_s16, 2  ;;  %p351_p2 = scmp.lt.s32.totalorder %s1586_s15, 3 }
   0x5   : > { %s1812_s16 = smov (%p35_p1, %s33_s16), 0  ;;  %p352_p3 = pnand %p1232_p0, %p351_p2 }
   0x6   : > { %v1540_v0 = vld [vmem:[%s1800_s2] sm:$0xff] (!%p352_p3)   ;;  %v1542_v2 = vld [vmem:[%s1800_s2 + $0x8] sm:$0xff] (!%p352_p3)   ;;  %p420_p4 = scmp.lt.s32.totalorder (!%p352_p3), %s1578_s13, 1  ;;  %v1544_v4 = vld [vmem:[%s1800_s2 + $0x10] sm:$0xff] (!%p352_p3)   ;;  %v473_v5 = vlaneseq (!%p352_p3) }
   0x7   : > { %355 = sbr.rel (%p352_p3) target bundleno = 292 (0x124), region = 52  ;;  %v1541_v1 = vld [vmem:[%s1801_s3] sm:$0xff] (!%p352_p3)   ;;  %1428 = vmatprep.subr.bf16.mxu0 (!%p352_p3), %v1540_v0  ;;  %v1543_v3 = vld [vmem:[%s1801_s3 + $0x8] sm:$0xff] (!%p352_p3)   ;;  %v1545_v6 = vld [vmem:[%s1801_s3 + $0x10] sm:$0xff] (!%p352_p3)  }
   0x8   : > { %1452 = vmatprep.subr.bf16.mxu1 (!%p352_p3), %v1541_v1  ;;  %1429 = vmatpush3.bf16.msra.mxu0 (!%p352_p3), %v1540_v0  ;;  %v1546_v7 = vld [vmem:[%s1800_s2 + $0x18] sm:$0xff] (!%p352_p3)   ;;  %v474_v8 = vshrl.u32 (!%p352_p3), %v473_v5, 7  ;;  %v1548_v10 = vld [vmem:[%s1800_s2 + $0x20] sm:$0xff] (!%p352_p3)   ;;  %v1550_v14 = vld [vmem:[%s1800_s2 + $0x28] sm:$0xff] (!%p352_p3)  }
   0x9   : > { %1453 = vmatpush3.bf16.msra.mxu1 (!%p352_p3), %v1541_v1  ;;  %1430 = vmatprep.subr.bf16.mxu0 (!%p352_p3), %v1542_v2  ;;  %v1547_v9 = vld [vmem:[%s1801_s3 + $0x18] sm:$0xff] (!%p352_p3)   ;;  %v1549_v12 = vld [vmem:[%s1801_s3 + $0x20] sm:$0xff] (!%p352_p3)   ;;  %v1551_v18 = vld [vmem:[%s1801_s3 + $0x28] sm:$0xff] (!%p352_p3)  }
   0xa   : > { %1454 = vmatprep.subr.bf16.mxu1 (!%p352_p3), %v1543_v3  ;;  %v475_v11 = vsub.s32 (!%p352_p3), 0, %v474_v8  ;;  %v487_v13 = vsub.s32 (!%p352_p3), 1, %v474_v8  ;;  %v1552_v25 = vld [vmem:[%s1800_s2 + $0x30] sm:$0xff] (!%p352_p3)   ;;  %v1554_v34 = vld [vmem:[%s1800_s2 + $0x38] sm:$0xff] (!%p352_p3)   ;;  %v1556_v42 = vld [vmem:[%s1802_s4] sm:$0xff] (!%p352_p3)  }
   0xb   : > { %v1553_v26 = vld [vmem:[%s1801_s3 + $0x30] sm:$0xff] (!%p352_p3)   ;;  %v1555_v35 = vld [vmem:[%s1801_s3 + $0x38] sm:$0xff] (!%p352_p3)   ;;  %v1557_v48 = vld [vmem:[%s1802_s4 + $0x8] sm:$0xff] (!%p352_p3)  }
   0xc   : > { %1431 = vmatpush3.bf16.msra.mxu0 (!%p352_p3), %v1542_v2  ;;  %v1558_v52 = vld [vmem:[%s1802_s4 + $0x10] sm:$0xff] (!%p352_p3)   ;;  %v1559_v54 = vld [vmem:[%s1802_s4 + $0x18] sm:$0xff] (!%p352_p3)   ;;  %v1560_v55 = vld [vmem:[%s1802_s4 + $0x20] sm:$0xff] (!%p352_p3)  }
   0xd   : > { %1455 = vmatpush3.bf16.msra.mxu1 (!%p352_p3), %v1543_v3  ;;  %1432 = vmatprep.subr.bf16.mxu0 (!%p352_p3), %v1544_v4  ;;  %v1561_v56 = vld [vmem:[%s1802_s4 + $0x28] sm:$0xff] (!%p352_p3)   ;;  %v1562_v57 = vld [vmem:[%s1802_s4 + $0x30] sm:$0xff] (!%p352_p3)   ;;  %v1563_v58 = vld [vmem:[%s1802_s4 + $0x38] sm:$0xff] (!%p352_p3)  }
   0xe   : > { %s1814_s13 = smov (!%p420_p4, %s1578_s13), 1  ;;  %1456 = vmatprep.subr.bf16.mxu1 %v1545_v6  ;;  %v1242_v59 = vld [vmem:[%s1803_s5] ss:$0 sm:$0xff] }
   0xf   : > { %s1295_s17 = sshll.u32 %s1814_s13, 6  ;;  %s1235_s18 = sshll.u32 %s1814_s13, 1  ;;  %v1259_v60 = vld [vmem:[%s1804_s6] ss:$0 sm:$0xff] }
  0x10   : > { %1433 = vmatpush3.bf16.msra.mxu0 %v1544_v4  ;;  %s1698_s25 = scalar_lea.vmem %s1798_s0, %s1295_s17  ;;  %s432_s28 = scalar_lea.vmem %s1799_s1, %s1235_s18 }
  0x11   : > { %1457 = vmatpush3.bf16.msra.mxu1 %v1545_v6  ;;  %1434 = vmatprep.subr.bf16.mxu0 %v1546_v7  ;;  %v464_v15 = vld [vmem:[%s1698_s25] sm:$0xff]  ;;  %v465_v16 = vld [vmem:[%s1698_s25 + $0x8] sm:$0xff]  ;;  %v466_v21 = vld [vmem:[%s1698_s25 + $0x10] sm:$0xff] }
  0x12   : > { %1458 = vmatprep.subr.bf16.mxu1 %v1547_v9  ;;  %v472_v17 = vld [vmem:[%s432_s28] sm:$0x3]  ;;  %v467_v24 = vld [vmem:[%s1698_s25 + $0x18] sm:$0xff]  ;;  %v469_v33 = vld [vmem:[%s1698_s25 + $0x28] sm:$0xff] }
  0x13   : > { %v476_v19 = vrot.slane %v472_v17, %v475_v11  ;;  %v488_v20 = vrot.slane %v472_v17, %v487_v13  ;;  %v468_v31 = vld [vmem:[%s1698_s25 + $0x20] sm:$0xff]  ;;  %v470_v40 = vld [vmem:[%s1698_s25 + $0x30] sm:$0xff]  ;;  %v471_v41 = vld [vmem:[%s1698_s25 + $0x38] sm:$0xff]  ;;  %s1760_s25 = sshll.u32 %s1814_s13, 5 }
  0x14   : > { %1435 = vmatpush3.bf16.msra.mxu0 %v1546_v7  ;;  %s1766_s12 = scalar_lea.vmem %s1806_s8, %s1760_s25  ;;  %s1772_s18 = scalar_lea.vmem %s1807_s9, %s1760_s25 }
  0x15   : > { %1459 = vmatpush3.bf16.msra.mxu1 %v1547_v9  ;;  %1436 = vmatprep.subr.bf16.mxu0 %v1548_v10  ;;  %v477_v22 = vmul.f32 %v476_v19, %v464_v15  ;;  %v478_v23 = vmul.f32 %v476_v19, %v465_v16  ;;  %v479_v29 = vmul.f32 %v476_v19, %v466_v21  ;;  %s461_s23 = scalar_lea.vmem %s1808_s10, %s1760_s25 }
  0x16   : > { %1460 = vmatprep.subr.bf16.mxu1 %v1549_v12  ;;  %v480_v30 = vmul.f32 %v476_v19, %v467_v24  ;;  %v481_v36 = vmul.f32 %v476_v19, %v468_v31  ;;  %v482_v37 = vmul.f32 %v476_v19, %v469_v33  ;;  %v483_v46 = vmul.f32 %v476_v19, %v470_v40 }
  0x17   : > { %v489_v27 = vadd.f32 %v488_v20, %v477_v22  ;;  %v490_v28 = vadd.f32 %v488_v20, %v478_v23  ;;  %v491_v38 = vadd.f32 %v488_v20, %v479_v29  ;;  %v484_v47 = vmul.f32 %v476_v19, %v471_v41 }
  0x18   : > { %1437 = vmatpush3.bf16.msra.mxu0 %v1548_v10  ;;  %v492_v39 = vadd.f32 %v488_v20, %v480_v30  ;;  %v493_v43 = vadd.f32 %v488_v20, %v481_v36  ;;  %v494_v44 = vadd.f32 %v488_v20, %v482_v37  ;;  %v495_v50 = vadd.f32 %v488_v20, %v483_v46 }
  0x19   : > { %1461 = vmatpush3.bf16.msra.mxu1 %v1549_v12  ;;  %1438 = vmatprep.subr.bf16.mxu0 %v1550_v14  ;;  %v497_v32 = vpack.c.bf16 %v490_v28, %v489_v27  ;;  %v496_v51 = vadd.f32 %v488_v20, %v484_v47 }
  0x1a   : > { %1462 = vmatprep.subr.bf16.mxu1 %v1551_v18  ;;  %v498_v45 = vpack.c.bf16 %v492_v39, %v491_v38  ;;  %v499_v49 = vpack.c.bf16 %v494_v44, %v493_v43  ;;  %v1276_v38 = vld [vmem:[%s1805_s7] ss:$0 sm:$0xff] }
  0x1b   : > { %1444 = vmatprep.mubr.bf16.mxu0 %v497_v32  ;;  %1468 = vmatprep.mubr.bf16.mxu1 %v497_v32  ;;  %v500_v53 = vpack.c.bf16 %v496_v51, %v495_v50 }
  0x1c   : > { %1439 = vmatpush3.bf16.msra.mxu0 %v1550_v14 }
  0x1d   : > { %1463 = vmatpush3.bf16.msra.mxu1 %v1551_v18  ;;  %1440 = vmatprep.subr.bf16.mxu0 %v1552_v25 }
  0x1e   : > { %1464 = vmatprep.subr.bf16.mxu1 %v1553_v26 }
  0x20   : > { %1441 = vmatpush3.bf16.msra.mxu0 %v1552_v25 }
  0x21   : > { %1465 = vmatpush3.bf16.msra.mxu1 %v1553_v26  ;;  %1442 = vmatprep.subr.bf16.mxu0 %v1554_v34 }
  0x22   : > { %1466 = vmatprep.subr.bf16.mxu1 %v1555_v35 }
  0x24   : > { %1443 = vmatpush3.bf16.msra.mxu0 %v1554_v34 }
  0x25   : > { %1467 = vmatpush3.bf16.msra.mxu1 %v1555_v35  ;;  %1476 = vmatprep.subr.bf16.mxu0 %v1556_v42 }
  0x26   : > { %1500 = vmatprep.subr.bf16.mxu1 %v1556_v42 }
  0x27   : > { %1445 = vmatmul.mubr.bf16.vlgmr.msra.gmra.mrb[0].mxu0 %v498_v45 }
  0x28   : > { %1469 = vmatmul.mubr.bf16.vlgmr.msra.gmra.mrb[0].mxu1 %v498_v45  ;;  %1477 = vmatpush3.bf16.msra.mxu0 %v1556_v42 }
  0x29   : > { %1508 = vmatpush3.bf16.msra.mxu1 %v1556_v42  ;;  %1478 = vmatprep.subr.bf16.mxu0 %v1557_v48 }
  0x2a   : > { %1501 = vmatprep.subr.bf16.mxu1 %v1557_v48  ;;  %1448 = vmatprep.mubr.bf16.mxu0 %v499_v49 }
  0x2b   : > { %1472 = vmatprep.mubr.bf16.mxu1 %v499_v49 }
  0x2c   : > { %1479 = vmatpush3.bf16.msra.mxu0 %v1557_v48 }
  0x2d   : > { %1509 = vmatpush3.bf16.msra.mxu1 %v1557_v48  ;;  %1480 = vmatprep.subr.bf16.mxu0 %v1558_v52 }
  0x2e   : > { %1502 = vmatprep.subr.bf16.mxu1 %v1558_v52 }
  0x2f   : > { %1449 = vmatmul.mubr.bf16.gmra.mrb[4].mxu0 %v500_v53 }
  0x30   : > { %1481 = vmatpush3.bf16.msra.mxu0 %v1558_v52  ;;  %1473 = vmatmul.mubr.bf16.gmra.mrb[4].mxu1 %v500_v53 }
  0x31   : > { %1510 = vmatpush3.bf16.msra.mxu1 %v1558_v52  ;;  %1482 = vmatprep.subr.bf16.mxu0 %v1559_v54 }
  0x32   : > { %1503 = vmatprep.subr.bf16.mxu1 %v1559_v54  ;;  %1492 = vmatprep.mubr.bf16.mxu0 %v497_v32 }
  0x33   : > { %1496 = vmatprep.mubr.bf16.mxu1 %v499_v49 }
  0x34   : > { %1483 = vmatpush3.bf16.msra.mxu0 %v1559_v54 }
  0x35   : > { %1511 = vmatpush3.bf16.msra.mxu1 %v1559_v54  ;;  %1484 = vmatprep.subr.bf16.mxu0 %v1560_v55 }
  0x36   : > { %1504 = vmatprep.subr.bf16.mxu1 %v1560_v55 }
  0x38   : > { %1485 = vmatpush3.bf16.msra.mxu0 %v1560_v55 }
  0x39   : > { %1512 = vmatpush3.bf16.msra.mxu1 %v1560_v55  ;;  %1486 = vmatprep.subr.bf16.mxu0 %v1561_v56 }
  0x3a   : > { %1505 = vmatprep.subr.bf16.mxu1 %v1561_v56 }
  0x3c   : > { %1487 = vmatpush3.bf16.msra.mxu0 %v1561_v56 }
  0x3d   : > { %1513 = vmatpush3.bf16.msra.mxu1 %v1561_v56  ;;  %1488 = vmatprep.subr.bf16.mxu0 %v1562_v57 }
  0x3e   : > { %1506 = vmatprep.subr.bf16.mxu1 %v1562_v57 }
  0x40   : > { %1489 = vmatpush3.bf16.msra.mxu0 %v1562_v57 }
  0x41   : > { %1514 = vmatpush3.bf16.msra.mxu1 %v1562_v57  ;;  %1490 = vmatprep.subr.bf16.mxu0 %v1563_v58 }
  0x42   : > { %1507 = vmatprep.subr.bf16.mxu1 %v1563_v58 }
  0x44   : > { %1491 = vmatpush3.bf16.msra.mxu0 %v1563_v58 }
  0x45   : > { %1515 = vmatpush3.bf16.msra.mxu1 %v1563_v58 }
  0x47   : > { %1493 = vmatmul.mubr.bf16.vlgmr.msra.gmra.mrb[8].mxu0 %v498_v45 }
  0x48   : > { %1497 = vmatmul.mubr.bf16.vlgmr.msra.gmra.mrb[8].mxu1 %v500_v53 }
  0xfa   : > { %v1446_v61 = vpop.f32.mrb[0].mxu0 }
  0xfb   : > { %v615_v62 = vadd.f32 %v1446_v61, %v1242_v59  ;;  %v1470_v63 = vpop.f32.mrb[0].mxu1  ;;  %v606_v0 = vpop.f32.mrb[1].mxu0 }
  0xfc   : > { %v791_v1 = vadd.f32 %v1470_v63, %v1259_v60  ;;  %v782_v2 = vpop.f32.mrb[1].mxu1  ;;  %v1447_v3 = vpop.f32.mrb[2].mxu0  ;;  %v607_v7 = vadd.f32 %v1242_v59, %v606_v0 }
  0xfd   : > { %v618_v4 = vadd.f32 %v1447_v3, %v1242_v59  ;;  %v1471_v5 = vpop.f32.mrb[2].mxu1  ;;  %v609_v6 = vpop.f32.mrb[3].mxu0  ;;  %v783_v11 = vadd.f32 %v1259_v60, %v782_v2 }
  0xfe   : > { %v794_v8 = vadd.f32 %v1471_v5, %v1259_v60  ;;  %v610_v9 = vadd.f32 %v1242_v59, %v609_v6  ;;  %v785_v10 = vpop.f32.mrb[3].mxu1 }
  0xff   : > { %v1331_v12 = vpack.c.bf16 %v618_v4, %v615_v62  ;;  %v786_v13 = vadd.f32 %v1259_v60, %v785_v10 }
 0x100   : > { %v1351_v14 = vpack.c.bf16 %v794_v8, %v791_v1  ;;  %v1326_v15 = vpack.c.bf16 %v610_v9, %v607_v7 }
 0x101   : > { %1383 = vst [vmem:[%s1766_s12 + $0x8] sm:$0xff] %v1331_v12   ;;  %v1346_v16 = vpack.c.bf16 %v786_v13, %v783_v11 }
 0x102   : > { %1386 = vst [vmem:[%s1772_s18 + $0x8] sm:$0xff] %v1351_v14   ;;  %1327 = vst [vmem:[%s1766_s12] sm:$0xff] %v1326_v15   ;;  %v1450_v17 = vpop.f32.mrb[4].mxu0 }
 0x103   : > { %1347 = vst [vmem:[%s1772_s18] sm:$0xff] %v1346_v16   ;;  %v631_v18 = vadd.f32 %v1450_v17, %v1242_v59  ;;  %v1474_v19 = vpop.f32.mrb[4].mxu1  ;;  %v622_v20 = vpop.f32.mrb[5].mxu0 }
 0x104   : > { %v807_v21 = vadd.f32 %v1474_v19, %v1259_v60  ;;  %v623_v22 = vadd.f32 %v1242_v59, %v622_v20  ;;  %v798_v23 = vpop.f32.mrb[5].mxu1  ;;  %v1451_v24 = vpop.f32.mrb[6].mxu0 }
 0x105   : > { %v799_v25 = vadd.f32 %v1259_v60, %v798_v23  ;;  %v634_v26 = vadd.f32 %v1451_v24, %v1242_v59  ;;  %v1475_v27 = vpop.f32.mrb[6].mxu1  ;;  %v625_v28 = vpop.f32.mrb[7].mxu0 }
 0x106   : > { %v810_v29 = vadd.f32 %v1475_v27, %v1259_v60  ;;  %v626_v30 = vadd.f32 %v1242_v59, %v625_v28  ;;  %v801_v31 = vpop.f32.mrb[7].mxu1 }
 0x107   : > { %v1341_v32 = vpack.c.bf16 %v634_v26, %v631_v18  ;;  %v802_v33 = vadd.f32 %v1259_v60, %v801_v31 }
 0x108   : > { %v1361_v34 = vpack.c.bf16 %v810_v29, %v807_v21  ;;  %v1336_v35 = vpack.c.bf16 %v626_v30, %v623_v22 }
 0x109   : > { %1385 = vst [vmem:[%s1766_s12 + $0x18] sm:$0xff] %v1341_v32   ;;  %v1356_v36 = vpack.c.bf16 %v802_v33, %v799_v25 }
 0x10a   : > { %1388 = vst [vmem:[%s1772_s18 + $0x18] sm:$0xff] %v1361_v34   ;;  %1384 = vst [vmem:[%s1766_s12 + $0x10] sm:$0xff] %v1336_v35  }
 0x10b   : > { %1387 = vst [vmem:[%s1772_s18 + $0x10] sm:$0xff] %v1356_v36  }
 0x11a   : > { %v1494_v37 = vpop.f32.mrb[8].mxu0 }
 0x11b   : > { %v1498_v39 = vpop.f32.mrb[8].mxu1  ;;  %v958_v40 = vpop.f32.mrb[9].mxu0  ;;  %v967_v43 = vadd.f32 %v1494_v37, %v1276_v38 }
 0x11c   : > { %v974_v41 = vpop.f32.mrb[9].mxu1  ;;  %v1495_v42 = vpop.f32.mrb[10].mxu0  ;;  %v983_v47 = vadd.f32 %v1498_v39, %v1276_v38  ;;  %v959_v48 = vadd.f32 %v1276_v38, %v958_v40 }
 0x11d   : > { %v970_v44 = vadd.f32 %v1495_v42, %v1276_v38  ;;  %v1499_v45 = vpop.f32.mrb[10].mxu1  ;;  %v961_v46 = vpop.f32.mrb[11].mxu0  ;;  %v975_v52 = vadd.f32 %v1276_v38, %v974_v41 }
 0x11e   : > { %v986_v49 = vadd.f32 %v1499_v45, %v1276_v38  ;;  %v962_v50 = vadd.f32 %v1276_v38, %v961_v46  ;;  %v977_v51 = vpop.f32.mrb[11].mxu1 }
 0x11f   : > { %v1371_v53 = vpack.c.bf16 %v970_v44, %v967_v43  ;;  %v978_v54 = vadd.f32 %v1276_v38, %v977_v51 }
 0x120   : > { %v1381_v55 = vpack.c.bf16 %v986_v49, %v983_v47  ;;  %v1366_v56 = vpack.c.bf16 %v962_v50, %v959_v48 }
 0x121   : > { %1389 = vst [vmem:[%s461_s23 + $0x8] sm:$0xff] %v1371_v53   ;;  %v1376_v57 = vpack.c.bf16 %v978_v54, %v975_v52 }
 0x122   : > { %1391 = vst [vmem:[%s461_s23 + $0x18] sm:$0xff] %v1381_v55   ;;  %1367 = vst [vmem:[%s461_s23] sm:$0xff] %v1366_v56  }
 0x123   : > { %1390 = vst [vmem:[%s461_s23 + $0x10] sm:$0xff] %v1376_v57  }
 0x124 PF: > { %s21_s15 = sadd.s32 1, %s1586_s15   ;;  %s1809_s13 = smov %s1582_s14 }
 0x125   : > { %p18_p5 = scmp.ge.s32.totalorder %s21_s15, 4   ;;  %s1810_s14 = smov %s1812_s16 }
 0x127   :  { %20 = sbr.rel (!%p18_p5) target bundleno = 2 (0x2), region = 109 }

// kernel: _attn_block_impl.5
= control target key start
LH: loop header
LB: loop body
LE: loop exit
PB: predicated region body
PF: predicated region fallthrough
CT: control target
= control target key end

     0   :  { %11 = vsyncpa [#allocation3], 0  ;;  %s1550_s0 = inlined_call_operand.vmem [shape: f32[2,64,128], index: 0, kind: input, shape index: {}]   ;;  %s1551_s1 = inlined_call_operand.vmem [shape: bf16[2,64,128], index: 1, kind: input, shape index: {}]   ;;  %s1552_s2 = inlined_call_operand.vmem [shape: bf16[2,64,128], index: 2, kind: input, shape index: {}]   ;;  %s1553_s3 = inlined_call_operand.vmem [shape: bf16[2,64,128], index: 3, kind: input, shape index: {}]   ;;  %s1554_s4 = inlined_call_operand.vmem [shape: bf16[128,128], index: 4, kind: input, shape index: {}]   ;;  %s1555_s5 = inlined_call_operand.vmem [shape: f32[1,128], index: 5, kind: input, shape index: {}]   ;;  %s1556_s6 = inlined_call_operand.hbm [shape: f32[2,64,128], index: 6, kind: output, shape index: {}]  }
   0x1   :  { %13 = vsyncpa [#allocation3 + $0x1], 0  ;;  %s1356_s21 = smov 0   ;;  %s1358_s22 = smov 0  }
   0x2   :  { %s1360_s23 = smov 0   ;;  %s1362_s24 = smov 0  }
   0x3   :  { %s1364_s25 = smov 0   ;;  %s1366_s26 = smov 0  }
   0x4 LB: > { %s996_s27 = sadd.s32 4294967295, %s1316_s26   ;;  %s997_s28 = sadd.s32 4294967294, %s1316_s26   ;;  %s1316_s26 = sphi %s1366_s26, %s19_s26   ;;  %s1312_s25 = sphi %s1364_s25, %s1563_s25   ;;  %s1308_s24 = sphi %s1362_s24, %s1562_s24   ;;  %s1304_s23 = sphi %s1360_s23, %s1561_s23   ;;  %s1300_s22 = sphi %s1358_s22, %s1560_s22   ;;  %s1296_s21 = sphi %s1356_s21, %s1559_s21  }
   0x5   : > { %s31_s29 = sadd.s32 1, %s1312_s25  ;;  %s190_s30 = sadd.s32 1, %s1304_s23 }
   0x6   : > { %p33_p0 = scmp.ge.s32.totalorder %s31_s29, 2  ;;  %p200_p1 = scmp.ne.s32.totalorder %s1304_s23, %s1300_s22 }
   0x7   : > { %p201_p2 = scmp.eq.s32.totalorder %s996_s27, 1  ;;  %p206_p3 = scmp.ne.s32.totalorder %s1300_s22, %s1296_s21 }
   0x8   : > { %s1565_s29 = smov (%p33_p0, %s31_s29), 0  ;;  %p207_p5 = scmp.eq.s32.totalorder %s997_s28, 1 }
   0x9   : > { %p1396_p4 = por %p201_p2, %p200_p1  ;;  %s185_s8 = ssub.s32 %s1312_s25, %s1565_s29 }
   0xa   : > { %p1000_p6 = scmp.ge.s32.totalorder %s1316_s26, 1  ;;  %p188_p7 = scmp.eq.s32.totalorder %s185_s8, 0 }
   0xb   : > { %p1403_p8 = por %p207_p5, %p206_p3  ;;  %p273_p9 = scmp.lt.s32.totalorder %s1316_s26, 3 }
   0xc   : > { %s1409_s10 = scalar_select %p188_p7, %s1304_s23, %s190_s30  }
   0xd   : > { %p274_p10 = pnand %p1000_p6, %p273_p9 }
   0xe   : > { %p327_p11 = scmp.lt.s32.totalorder (!%p274_p10), %s1308_s24, 1  ;;  %vm520_vm0 = vcmask (!%p274_p10), 523264   ;;  %s323_s13 = sand.u32 (!%p274_p10), 1, %s1300_s22  }
   0xf   : > { %277 = sbr.rel (%p274_p10) target bundleno = 900 (0x384), region = 44  ;;  %s1001_s19 = sshll.u32 (!%p274_p10), %s323_s13, 6 }
  0x10   : > { %s1044_s20 = sshll.u32 (!%p274_p10), %s1308_s24, 10  ;;  %s1318_s14 = smov (!%p274_p10), [#allocation2]  }
  0x11   : > { %s1498_s8 = scalar_lea.hbm (!%p274_p10), %s1556_s6, %s1044_s20 }
  0x16   : > { %s1413_s11 = scalar_select %p327_p11, %s1308_s24, 1 }
  0x17   : > { %s1504_s24 = scalar_lea.sflag [#allocation3], %s323_s13 }
  0x18   : > { %s1416_s12 = sshll.u32 %s1413_s11, 5 }
  0x19   : > { %s350_s15 = scalar_lea.vmem %s1552_s2, %s1416_s12  ;;  %s344_s18 = scalar_lea.vmem %s1551_s1, %s1416_s12 }
  0x1a   : > { %v1186_v0 = vld [vmem:[%s350_s15] sm:$0xff]   ;;  %v1187_v1 = vld [vmem:[%s350_s15 + $0x8] sm:$0xff]   ;;  %v1188_v3 = vld [vmem:[%s350_s15 + $0x10] sm:$0xff]   ;;  %s355_s27 = scalar_lea.vmem %s1553_s3, %s1416_s12  ;;  %s1040_s12 = sshll.u32 %s1413_s11, 6 }
  0x1b   : > { %1073 = vmatprep.subr.bf16.mxu0 %v1186_v0  ;;  %v1190_v2 = vld [vmem:[%s344_s18] sm:$0xff]   ;;  %v1189_v4 = vld [vmem:[%s350_s15 + $0x18] sm:$0xff]   ;;  %v1191_v5 = vld [vmem:[%s344_s18 + $0x8] sm:$0xff]   ;;  %s1479_s16 = scalar_lea.vmem %s1550_s0, %s1040_s12  ;;  %s325_s11 = scalar_lea.vmem [#allocation2], %s1001_s19 }
  0x1c   : > { %1074 = vmatpush3.bf16.xpose.msra.mxu0 %v1186_v0  ;;  %1081 = vmatprep.mubr.bf16.mxu0 %v1190_v2  ;;  %v1192_v6 = vld [vmem:[%s344_s18 + $0x10] sm:$0xff]   ;;  %v1193_v7 = vld [vmem:[%s344_s18 + $0x18] sm:$0xff]   ;;  %v1194_v24 = vld [vmem:[%s355_s27] sm:$0xff]   ;;  %s1242_s15 = sshll.u32 %s1318_s14, 4  ;;  %s1243_s15 = int_to_ptr.vmem [resolvable:$false] %s1242_s15 }
  0x1d   : > { %1075 = vmatprep.subr.bf16.mxu0 %v1187_v1  ;;  %1089 = vmatprep.subr.bf16.mxu1 %v1194_v24  ;;  %v1195_v25 = vld [vmem:[%s355_s27 + $0x8] sm:$0xff]   ;;  %v1196_v26 = vld [vmem:[%s355_s27 + $0x10] sm:$0xff]   ;;  %v1197_v27 = vld [vmem:[%s355_s27 + $0x18] sm:$0xff]   ;;  %s869_s27 = sshll.u32 %s325_s11, 4  ;;  %s1500_s27 = int_to_ptr.vmem [resolvable:$true] %s869_s27 }
  0x1e   : > { %1090 = vmatpush3.bf16.msra.mxu1 %v1194_v24  ;;  %s1238_s12 = scalar_lea.vmem %s1500_s27, 1024  ;;  %p1245_p1 = scmp.lt.s32.totalorder %s1500_s27, %s1243_s15 }
  0x1f   : > { %1091 = vmatprep.subr.bf16.mxu1 %v1195_v25  ;;  %p1239_p12 = scmp.ne.s32.totalorder %s1500_s27, %s1238_s12 }
  0x21   : > { %p1240_p13 = pnand %p1239_p12, %p1396_p4 }
  0x22   : > { %1092 = vmatpush3.bf16.msra.mxu1 %v1195_v25 }
  0x23   : > { %1093 = vmatprep.subr.bf16.mxu1 %v1196_v26  ;;  %p1241_p0 = pneg %p1240_p13 }
  0x24   : > { %1076 = vmatpush3.bf16.xpose.msra.mxu0 %v1187_v1 }
  0x25   : > { %1077 = vmatprep.subr.bf16.mxu0 %v1188_v3 }
  0x26   : > { %1094 = vmatpush3.bf16.msra.mxu1 %v1196_v26 }
  0x27   : > { %1095 = vmatprep.subr.bf16.mxu1 %v1197_v27 }
  0x2a   : > { %1096 = vmatpush3.bf16.msra.mxu1 %v1197_v27 }
  0x2c   : > { %1078 = vmatpush3.bf16.xpose.msra.mxu0 %v1188_v3 }
  0x2d   : > { %1079 = vmatprep.subr.bf16.mxu0 %v1189_v4 }
  0x34   : > { %1080 = vmatpush3.bf16.xpose.msra.mxu0 %v1189_v4 }
  0x3b   : > { %1082 = vmatmul.mubr.bf16.vlgmr.msra.gmra.mrb[0].mxu0 %v1191_v5 }
  0x3c   : > { %1085 = vmatprep.mubr.bf16.mxu0 %v1192_v6 }
  0x43   : > { %1086 = vmatmul.mubr.bf16.gmra.mrb[4].mxu0 %v1193_v7 }
 0x10e   : > { %v1083_v8 = vpop.f32.mrb[0].mxu0 }
 0x10f   : > { %v489_v9 = vpop.f32.mrb[1].mxu0  ;;  %v527_v10 = vsel %vm520_vm0, %v1083_v8, -inf }
 0x110   : > { %528 = vmax.xlane.f32.xlu1 %v527_v10  ;;  %v1084_v11 = vpop.f32.mrb[2].mxu0  ;;  %v521_v12 = vsel %vm520_vm0, %v489_v9, -inf  ;;  %v1200_v10 = vld [vmem:[%s1554_s4 + $0x10] sm:$0xff]  }
 0x111   : > { %522 = vmax.xlane.f32.xlu0 %v521_v12  ;;  %v492_v13 = vpop.f32.mrb[3].mxu0  ;;  %v530_v14 = vsel %vm520_vm0, %v1084_v11, -inf  ;;  %v1202_v12 = vld [vmem:[%s1554_s4 + $0x20] sm:$0xff]  }
 0x112   : > { %v524_v15 = vsel %vm520_vm0, %v492_v13, -inf }
 0x114   : > { %531 = vmax.xlane.f32.xlu1 %v530_v14  ;;  %v1204_v14 = vld [vmem:[%s1554_s4 + $0x30] sm:$0xff]  }
 0x115   : > { %525 = vmax.xlane.f32.xlu0 %v524_v15  ;;  %v1205_v15 = vld [vmem:[%s1554_s4 + $0x38] sm:$0xff]  }
 0x116   : > { %v1087_v16 = vpop.f32.mrb[4].mxu0 }
 0x117   : > { %v505_v17 = vpop.f32.mrb[5].mxu0  ;;  %v539_v22 = vsel %vm520_vm0, %v1087_v16, -inf }
 0x118   : > { %v1088_v18 = vpop.f32.mrb[6].mxu0  ;;  %v533_v19 = vsel %vm520_vm0, %v505_v17, -inf }
 0x119   : > { %534 = vmax.xlane.f32.xlu0 %v533_v19  ;;  %v508_v20 = vpop.f32.mrb[7].mxu0  ;;  %v542_v23 = vsel %vm520_vm0, %v1088_v18, -inf }
 0x11a   : > { %v536_v21 = vsel %vm520_vm0, %v508_v20, -inf }
 0x11b   : > { %537 = vmax.xlane.f32.xlu1 %v536_v21 }
 0x11d   : > { %540 = vmax.xlane.f32.xlu0 %v539_v22 }
 0x11f   : > { %543 = vmax.xlane.f32.xlu1 %v542_v23 }
 0x19d   : > { %v529_v28 = vpop.xlane.xlu1 %528 }
 0x19e   : > { %v547_v29 = vsub.f32 %v1083_v8, %v529_v28  ;;  %v523_v30 = vpop.xlane.xlu0 %522  ;;  %v1198_v8 = vld [vmem:[%s1554_s4] sm:$0xff]  }
 0x19f   : > { %v545_v31 = vsub.f32 %v489_v9, %v523_v30  ;;  %v1199_v9 = vld [vmem:[%s1554_s4 + $0x8] sm:$0xff]   ;;  %1105 = vmatprep.subr.bf16.mxu1 %v1198_v8 }
 0x1a0   : > { %v557_v32 = vmul.f32 1.442695, %v547_v29 }
 0x1a1   : > { %v553_v33 = vmul.f32 1.442695, %v545_v31  ;;  %v532_v34 = vpop.xlane.xlu1 %531 }
 0x1a2   : > { %v548_v35 = vsub.f32 %v1084_v11, %v532_v34  ;;  %v526_v36 = vpop.xlane.xlu0 %525  ;;  %v1201_v11 = vld [vmem:[%s1554_s4 + $0x18] sm:$0xff]  }
 0x1a3   : > { %1206 = vpow2.f32 %v553_v33  ;;  %v546_v37 = vsub.f32 %v492_v13, %v526_v36  ;;  %v1203_v13 = vld [vmem:[%s1554_s4 + $0x28] sm:$0xff]  }
 0x1a4   : > { %v559_v38 = vmul.f32 1.442695, %v548_v35  ;;  %1208 = vpow2.f32 %v557_v32 }
 0x1a5   : > { %v555_v39 = vmul.f32 1.442695, %v546_v37 }
 0x1a6   : > { %1210 = vpow2.f32 %v559_v38  ;;  %v535_v40 = vpop.xlane.xlu0 %534 }
 0x1a7   : > { %1212 = vpow2.f32 %v555_v39  ;;  %v549_v41 = vsub.f32 %v505_v17, %v535_v40 }
 0x1a8   : > { %v538_v42 = vpop.xlane.xlu1 %537 }
 0x1a9   : > { %v561_v43 = vmul.f32 1.442695, %v549_v41  ;;  %v550_v44 = vsub.f32 %v508_v20, %v538_v42 }
 0x1aa   : > { %v541_v45 = vpop.xlane.xlu0 %540 }
 0x1ab   : > { %1214 = vpow2.f32 %v561_v43  ;;  %v563_v46 = vmul.f32 1.442695, %v550_v44  ;;  %v551_v47 = vsub.f32 %v1087_v16, %v541_v45 }
 0x1ac   : > { %v544_v48 = vpop.xlane.xlu1 %543 }
 0x1ad   : > { %v1207_v49 = vpop.eup %1206  ;;  %1216 = vpow2.f32 %v563_v46  ;;  %v565_v50 = vmul.f32 1.442695, %v551_v47  ;;  %v552_v51 = vsub.f32 %v1088_v18, %v544_v48 }
 0x1ae   : > { %v569_v52 = vsel %vm520_vm0, %v1207_v49, 0.0  ;;  %v1209_v53 = vpop.eup %1208 }
 0x1af   : > { %1218 = vpow2.f32 %v565_v50  ;;  %v567_v54 = vmul.f32 1.442695, %v552_v51  ;;  %570 = vadd.xlane.f32.xlu0 %v569_v52  ;;  %v575_v58 = vsel %vm520_vm0, %v1209_v53, 0.0  ;;  %v1026_v52 = vld [vmem:[%s1555_s5] ss:$0 sm:$0xff] }
 0x1b0   : > { %v1211_v55 = vpop.eup %1210 }
 0x1b1   : > { %v1213_v56 = vpop.eup %1212  ;;  %1220 = vpow2.f32 %v567_v54  ;;  %v594_v57 = vpack.c.bf16 %v1211_v55, %v1209_v53  ;;  %v578_v63 = vsel %vm520_vm0, %v1211_v55, 0.0  ;;  %v401_v53 = vld [vmem:[%s1479_s16 + $0x10] sm:$0xff] }
 0x1b2   : > { %v572_v59 = vsel %vm520_vm0, %v1213_v56, 0.0  ;;  %v593_v60 = vpack.c.bf16 %v1213_v56, %v1207_v49  ;;  %v399_v56 = vld [vmem:[%s1479_s16] sm:$0xff] }
 0x1b3   : > { %576 = vadd.xlane.f32.xlu0 %v575_v58  ;;  %573 = vadd.xlane.f32.xlu1 %v572_v59  ;;  %v402_v59 = vld [vmem:[%s1479_s16 + $0x18] sm:$0xff] }
 0x1b4   : > { %1097 = vmatprep.mubr.msk.bf16.mxu1 %vm520_vm0, %v593_v60 }
 0x1b5   : > { %v1215_v61 = vpop.eup %1214  ;;  %1098 = vmatmul.mubr.msk.bf16.vlgmr.msra.gmra.mrb[0].mxu1 %vm520_vm0, %v594_v57 }
 0x1b6   : > { %v581_v62 = vsel %vm520_vm0, %v1215_v61, 0.0  ;;  %1106 = vmatpush3.bf16.msra.mxu1 %v1198_v8  ;;  %v403_v8 = vld [vmem:[%s1479_s16 + $0x20] sm:$0xff] }
 0x1b7   : > { %v1217_v0 = vpop.eup %1216  ;;  %582 = vadd.xlane.f32.xlu0 %v581_v62  ;;  %579 = vadd.xlane.f32.xlu1 %v578_v63  ;;  %v400_v63 = vld [vmem:[%s1479_s16 + $0x8] sm:$0xff] }
 0x1b8   : > { %v595_v1 = vpack.c.bf16 %v1217_v0, %v1215_v61  ;;  %v584_v4 = vsel %vm520_vm0, %v1217_v0, 0.0  ;;  %1107 = vmatprep.subr.bf16.mxu1 %v1199_v9 }
 0x1b9   : > { %v1219_v2 = vpop.eup %1218 }
 0x1ba   : > { %1101 = vmatprep.mubr.msk.bf16.mxu1 %vm520_vm0, %v595_v1  ;;  %v587_v3 = vsel %vm520_vm0, %v1219_v2, 0.0  ;;  %1108 = vmatpush3.bf16.msra.mxu1 %v1199_v9 }
 0x1bb   : > { %v1221_v5 = vpop.eup %1220  ;;  %588 = vadd.xlane.f32.xlu0 %v587_v3  ;;  %585 = vadd.xlane.f32.xlu1 %v584_v4 }
 0x1bc   : > { %v596_v6 = vpack.c.bf16 %v1221_v5, %v1219_v2  ;;  %v590_v7 = vsel %vm520_vm0, %v1221_v5, 0.0  ;;  %1109 = vmatprep.subr.bf16.mxu1 %v1200_v10  ;;  %v405_v5 = vld [vmem:[%s1479_s16 + $0x30] sm:$0xff] }
 0x1be   : > { %1102 = vmatmul.mubr.msk.bf16.gmra.mrb[4].mxu1 %vm520_vm0, %v596_v6 }
 0x1bf   : > { %591 = vadd.xlane.f32.xlu1 %v590_v7  ;;  %1110 = vmatpush3.bf16.msra.mxu1 %v1200_v10 }
 0x1c0   : > { %1111 = vmatprep.subr.bf16.mxu1 %v1201_v11 }
 0x1c3   : > { %1112 = vmatpush3.bf16.msra.mxu1 %v1201_v11  ;;  %v406_v11 = vld [vmem:[%s1479_s16 + $0x38] sm:$0xff] }
 0x1c4   : > { %1113 = vmatprep.subr.bf16.mxu1 %v1202_v12 }
 0x1c7   : > { %1114 = vmatpush3.bf16.msra.mxu1 %v1202_v12 }
 0x1c8   : > { %1115 = vmatprep.subr.bf16.mxu1 %v1203_v13 }
 0x1cb   : > { %1116 = vmatpush3.bf16.msra.mxu1 %v1203_v13 }
 0x1cc   : > { %1117 = vmatprep.subr.bf16.mxu1 %v1204_v14 }
 0x1cf   : > { %1118 = vmatpush3.bf16.msra.mxu1 %v1204_v14 }
 0x1d0   : > { %1119 = vmatprep.subr.bf16.mxu1 %v1205_v15 }
 0x1d3   : > { %1120 = vmatpush3.bf16.msra.mxu1 %v1205_v15  ;;  %v404_v15 = vld [vmem:[%s1479_s16 + $0x28] sm:$0xff]  ;;  %s1244_s16 = scalar_lea.vmem %s1243_s15, 2048 }
 0x1d4   : > { %p1246_p2 = scmp.lt.s32.totalorder %s1244_s16, %s1238_s12 }
 0x1d6   : > { %p1247_p3 = por %p1246_p2, %p1245_p1 }
 0x1d8   : > { %p1248_p5 = pnand %p1247_p3, %p1241_p0 }
 0x23c   : > { %v571_v16 = vpop.xlane.xlu0 %570 }
 0x23d   : > { %1222 = vrcp.f32 %v571_v16 }
 0x240   : > { %v574_v17 = vpop.xlane.xlu1 %573  ;;  %v577_v18 = vpop.xlane.xlu0 %576 }
 0x241   : > { %1224 = vrcp.f32 %v577_v18 }
 0x244   : > { %v580_v19 = vpop.xlane.xlu1 %579  ;;  %v583_v20 = vpop.xlane.xlu0 %582 }
 0x245   : > { %1226 = vrcp.f32 %v580_v19 }
 0x246   : > { %1228 = vrcp.f32 %v574_v17 }
 0x247   : > { %1230 = vrcp.f32 %v583_v20  ;;  %v1223_v24 = vpop.eup %1222 }
 0x248   : > { %v586_v21 = vpop.xlane.xlu1 %585  ;;  %v589_v22 = vpop.xlane.xlu0 %588 }
 0x249   : > { %1232 = vrcp.f32 %v589_v22 }
 0x24b   : > { %v1225_v26 = vpop.eup %1224 }
 0x24c   : > { %v592_v23 = vpop.xlane.xlu1 %591 }
 0x24d   : > { %1234 = vrcp.f32 %v592_v23 }
 0x24e   : > { %1236 = vrcp.f32 %v586_v21 }
 0x24f   : > { %v1227_v28 = vpop.eup %1226 }
 0x250   : > { %v1229_v30 = vpop.eup %1228 }
 0x251   : > { %v1231_v38 = vpop.eup %1230 }
 0x253   : > { %v1233_v40 = vpop.eup %1232 }
 0x257   : > { %v1235_v42 = vpop.eup %1234 }
 0x258   : > { %v1237_v44 = vpop.eup %1236 }
 0x288   : > { %v1099_v25 = vpop.f32.mrb[0].mxu1 }
 0x289   : > { %v667_v27 = vpop.f32.mrb[1].mxu1  ;;  %v708_v31 = vmul.f32 %v1225_v26, %v1099_v25 }
 0x28a   : > { %v1100_v29 = vpop.f32.mrb[2].mxu1  ;;  %v706_v34 = vmul.f32 %v1223_v24, %v667_v27 }
 0x28b   : > { %v709_v32 = vmul.f32 %v1227_v28, %v1100_v29  ;;  %v670_v33 = vpop.f32.mrb[3].mxu1 }
 0x28c   : > { %v707_v35 = vmul.f32 %v1229_v30, %v670_v33 }
 0x28d   : > { %v715_v36 = vpack.c.bf16 %v709_v32, %v708_v31 }
 0x28e   : > { %v714_v37 = vpack.c.bf16 %v707_v35, %v706_v34 }
 0x290   : > { %1121 = vmatprep.mubr.bf16.mxu1 %v714_v37 }
 0x291   : > { %v1103_v39 = vpop.f32.mrb[4].mxu1  ;;  %1122 = vmatmul.mubr.bf16.vlgmr.msra.gmra.mrb[8].mxu1 %v715_v36 }
 0x292   : > { %v683_v41 = vpop.f32.mrb[5].mxu1  ;;  %v712_v45 = vmul.f32 %v1233_v40, %v1103_v39 }
 0x293   : > { %v1104_v43 = vpop.f32.mrb[6].mxu1  ;;  %v710_v48 = vmul.f32 %v1231_v38, %v683_v41 }
 0x294   : > { %v713_v46 = vmul.f32 %v1235_v42, %v1104_v43  ;;  %v686_v47 = vpop.f32.mrb[7].mxu1 }
 0x295   : > { %v711_v49 = vmul.f32 %v1237_v44, %v686_v47 }
 0x296   : > { %v717_v50 = vpack.c.bf16 %v713_v46, %v712_v45 }
 0x297   : > { %v716_v51 = vpack.c.bf16 %v711_v49, %v710_v48 }
 0x299   : > { %1125 = vmatprep.mubr.bf16.mxu1 %v716_v51 }
 0x29a   : > { %1126 = vmatmul.mubr.bf16.gmra.mrb[12].mxu1 %v717_v50 }
 0x364   : > { %v1123_v54 = vpop.f32.mrb[8].mxu1 }
 0x365   : > { %v815_v55 = vadd.f32 %v1123_v54, %v1026_v52  ;;  %v806_v57 = vpop.f32.mrb[9].mxu1 }
 0x366   : > { %v807_v58 = vadd.f32 %v1026_v52, %v806_v57  ;;  %v1124_v60 = vpop.f32.mrb[10].mxu1 }
 0x367   : > { %v839_v61 = vadd.f32 %v815_v55, %v401_v53  ;;  %v818_v62 = vadd.f32 %v1124_v60, %v1026_v52  ;;  %v809_v0 = vpop.f32.mrb[11].mxu1 }
 0x368   : > { %v837_v1 = vadd.f32 %v807_v58, %v399_v56  ;;  %v810_v2 = vadd.f32 %v1026_v52, %v809_v0 }
 0x369   : > { %847 = vst [vmem:[%s325_s11 + $0x10] sm:$0xff] %v839_v61  ;;  %v840_v3 = vadd.f32 %v818_v62, %v402_v59 }
 0x36a   : > { %845 = vst [vmem:[%s325_s11] sm:$0xff] %v837_v1  ;;  %v838_v4 = vadd.f32 %v810_v2, %v400_v63 }
 0x36b   : > { %848 = vst [vmem:[%s325_s11 + $0x18] sm:$0xff] %v840_v3 }
 0x36c   : > { %846 = vst [vmem:[%s325_s11 + $0x8] sm:$0xff] %v838_v4 }
 0x36d   : > { %v1127_v6 = vpop.f32.mrb[12].mxu1 }
 0x36e   : > { %v831_v7 = vadd.f32 %v1127_v6, %v1026_v52  ;;  %v822_v9 = vpop.f32.mrb[13].mxu1 }
 0x36f   : > { %v823_v10 = vadd.f32 %v1026_v52, %v822_v9  ;;  %v1128_v12 = vpop.f32.mrb[14].mxu1 }
 0x370   : > { %v843_v13 = vadd.f32 %v831_v7, %v405_v5  ;;  %v834_v14 = vadd.f32 %v1128_v12, %v1026_v52  ;;  %v825_v16 = vpop.f32.mrb[15].mxu1 }
 0x371   : > { %v841_v17 = vadd.f32 %v823_v10, %v403_v8  ;;  %v826_v18 = vadd.f32 %v1026_v52, %v825_v16 }
 0x372   : > { %851 = vst [vmem:[%s325_s11 + $0x30] sm:$0xff] %v843_v13  ;;  %v844_v19 = vadd.f32 %v834_v14, %v406_v11 }
 0x373   : > { %849 = vst [vmem:[%s325_s11 + $0x20] sm:$0xff] %v841_v17  ;;  %v842_v20 = vadd.f32 %v826_v18, %v404_v15 }
 0x374   : > { %852 = vst [vmem:[%s325_s11 + $0x38] sm:$0xff] %v844_v19 }
 0x375   : > { %850 = vst [vmem:[%s325_s11 + $0x28] sm:$0xff] %v842_v20 }
 0x376   : > { %1251 = shalt.err (!%p1248_p5)
}
 0x377   : > { %s1252_s13 = scalar_lea.hbm %s1498_s8, 1024  ;;  %s1256_s19 = scalar_lea.hbm %s1556_s6, 2048 }
 0x378   : > { %p1253_p6 = scmp.ne.s32.totalorder %s1498_s8, %s1252_s13  ;;  %p1257_p10 = scmp.lt.u32.totalorder %s1498_s8, %s1556_s6 }
 0x379   : > { %p1258_p11 = scmp.lt.u32.totalorder %s1256_s19, %s1252_s13  ;;  %p1260_p13 = scmp.lt.u32.totalorder %s1252_s13, %s1498_s8 }
 0x37a   : > { %p1254_p7 = pnand %p1253_p6, %p1396_p4 }
 0x37b   : > { %p1259_p12 = por %p1258_p11, %p1257_p10 }
 0x37c   : > { %p1255_p9 = pneg %p1254_p7 }
 0x37d   : > { %p1261_p0 = por %p1260_p13, %p1259_p12 }
 0x37f   : > { %p1262_p1 = pnand %p1261_p0, %p1255_p9 }
 0x381   : > { %1265 = shalt.err (!%p1262_p1)
}
 0x382   : > { %s1319_s28 = smov 128   ;;  %s1320_s30 = smov 8  }
 0x383   : > { %1129 = dma.vmem_to_hbm [thread:$0]  (%p1396_p4), %s1500_s27, 1024, %s1498_s8, %s1504_s24, %s1319_s28, %s1319_s28, %s1320_s30  }
 0x384 PF: > { %p1135_p2 = scmp.ge.s32.totalorder %s1316_s26, 2  ;;  %s884_s12 = sand.u32 1, %s1296_s21  }
 0x385   : > { %s885_s14 = scalar_lea.sflag [#allocation3], %s884_s12 }
 0x386   : > { %p1132_p3 = pnand %p1135_p2, %p1403_p8 }
 0x388   : > { %1291 = dma.done.wait (!%p1132_p3), %s885_s14, 1024  }
 0x389   : > { %1293 = vsyncadd (!%p1132_p3), %s885_s14, 4294966272  ;;  %s19_s26 = sadd.s32 1, %s1316_s26   ;;  %s1559_s21 = smov %s1300_s22 }
 0x38a   : > { %p16_p5 = scmp.ge.s32.totalorder %s19_s26, 4   ;;  %s1560_s22 = smov %s1304_s23 }
 0x38b   : > { %s1561_s23 = smov %s1409_s10  ;;  %s1562_s24 = smov %s1312_s25 }
 0x38c   : > { %s1563_s25 = smov %s1565_s29  ;;  %18 = sbr.rel (!%p16_p5) target bundleno = 4 (0x4), region = 88 }
 0x393   :  { %890 = vsyncpa [#allocation3], 1 }
 0x394   :  { %892 = vsyncpa [#allocation3 + $0x1], 1 }

</bundles_post_ra>
